<compile_context>
chip_gen: v5e
topology: v5e:2x2
jax: 0.10.0
libtpu: 0.0.40
codegen_flags: <defaults>
</compile_context>

<pallas_src>
import functools

import jax
import jax.numpy as jnp
from jax.experimental import pallas as pl
from jax.experimental.pallas import tpu as pltpu

_LANE = 1024            # lane-dense stores (multiple of 128)
_MIB = 1024 * 1024

# Lazily-cached hardware config: (max_tile_rows, vmem_limit_bytes)
_TILE_CFG = None
# Lazily-cached result of the bool-output lowering probe.
_BOOL_OUT_OK = None


def _tile_config():
    """Pick tile size / scoped-VMEM limit by chip generation (VMEM capacity)."""
    global _TILE_CFG
    if _TILE_CFG is None:
        try:
            vmem_bytes = int(getattr(pltpu.get_tpu_info(),
                                     "vmem_capacity_bytes", 0))
        except Exception:
            vmem_bytes = 0
        if vmem_bytes >= 96 * _MIB:
            # v5e / v6e (128 MiB physical): ~1M-elem tile (~54 MiB dbl-buffered)
            _TILE_CFG = ((1024 * 1024) // _LANE, 72 * _MIB)
        else:
            # v7x (64 MiB physical) or unknown: ~512K-elem tile (~27 MiB)
            _TILE_CFG = ((512 * 1024) // _LANE, 44 * _MIB)
    return _TILE_CFG


def _elementwise_kernel(x_ref,
                        add_ref, sub_ref, mul_ref, div_ref, pow_ref,
                        gt_ref, lt_ref, eq_ref):
    x = x_ref[...]
    add_ref[...] = x + 2.0
    sub_ref[...] = x - 3.0
    mul_ref[...] = x * 4.0
    div_ref[...] = x * 0.5          # bit-exact for /2 in float32
    pow_ref[...] = x * x            # bit-exact for **2 in float32
    gt_ref[...] = (x > 1.0).astype(gt_ref.dtype)
    lt_ref[...] = (x < 5.0).astype(lt_ref.dtype)
    eq_ref[...] = (x == 3.0).astype(eq_ref.dtype)


def _bool_outputs_supported():
    """Probe (once) whether Mosaic lowers direct bool output stores correctly."""
    global _BOOL_OUT_OK
    if _BOOL_OUT_OK is None:
        try:
            rows, tile_r = 64, 32
            x = (jnp.arange(rows * _LANE, dtype=jnp.float32)
                 .reshape(rows, _LANE) % 7.0) - 3.0
            blk = pl.BlockSpec((tile_r, _LANE), lambda i: (i, 0))
            f_out = jax.ShapeDtypeStruct((rows, _LANE), jnp.float32)
            b_out = jax.ShapeDtypeStruct((rows, _LANE), jnp.bool_)
            outs = pl.pallas_call(
                _elementwise_kernel,
                out_shape=(f_out,) * 5 + (b_out,) * 3,
                grid=(rows // tile_r,),
                in_specs=[blk],
                out_specs=(blk,) * 8,
            )(x)
            _BOOL_OUT_OK = (bool(jnp.array_equal(outs[5], x > 1.0))
                            and bool(jnp.array_equal(outs[6], x < 5.0))
                            and bool(jnp.array_equal(outs[7], x == 3.0)))
        except Exception:
            _BOOL_OUT_OK = False
    return _BOOL_OUT_OK


@functools.partial(jax.jit,
                   static_argnames=("max_tile_rows", "vmem_limit_bytes",
                                    "use_bool_out"))
def _forward_impl(x, *, max_tile_rows, vmem_limit_bytes, use_bool_out):
    orig_shape = x.shape
    f_dtype = x.dtype
    n_elems = x.size
    cmp_dtype = jnp.bool_ if use_bool_out else jnp.uint8

    x_flat = jnp.reshape(x, (-1,))
    bulk = (n_elems // _LANE) * _LANE
    tail = n_elems - bulk

    bulk_outs = None
    if bulk:
        rows = bulk // _LANE
        tile_r = min(rows, max_tile_rows)
        if tile_r < rows:
            # multiple of 32 rows -> packed u8/bool stores stay unmasked
            tile_r = max(32, (tile_r // 32) * 32)
        # Guarantee >= 2 grid steps on non-trivial slabs so "parallel"
        # dimension semantics can shard the stream across v7x's 2 TensorCores.
        if rows >= 64 and tile_r >= rows:
            tile_r = min(rows, (((rows + 1) // 2) + 31) // 32 * 32)
        grid = (pl.cdiv(rows, tile_r),)

        x2d = jnp.reshape(x_flat[:bulk] if tail else x_flat, (rows, _LANE))

        blk = pl.BlockSpec((tile_r, _LANE), lambda i: (i, 0))
        f_out = jax.ShapeDtypeStruct((rows, _LANE), f_dtype)
        c_out = jax.ShapeDtypeStruct((rows, _LANE), cmp_dtype)

        bulk_outs = pl.pallas_call(
            _elementwise_kernel,
            out_shape=(f_out,) * 5 + (c_out,) * 3,
            grid=grid,
            in_specs=[blk],
            out_specs=(blk,) * 8,
            compiler_params=pltpu.CompilerParams(
                dimension_semantics=("parallel",),
                vmem_limit_bytes=vmem_limit_bytes,
            ),
            cost_estimate=pl.CostEstimate(
                flops=8 * bulk,
                transcendentals=0,
                bytes_accessed=bulk * (4 + 5 * 4 + 3 * 1),
            ),
        )(x2d)

    tail_outs = None
    if tail:
        xt = x_flat[bulk:]
        tail_outs = (xt + 2.0, xt - 3.0, xt * 4.0, xt * 0.5, xt * xt,
                     xt > 1.0, xt < 5.0, xt == 3.0)

    results = []
    for idx in range(8):
        is_cmp = idx >= 5
        if bulk_outs is not None:
            part = jnp.reshape(bulk_outs[idx], (-1,))
            if is_cmp and not use_bool_out:
                part = part.astype(jnp.bool_)
            if tail_outs is not None:
                part = jnp.concatenate([part, tail_outs[idx].astype(part.dtype)])
        else:
            part = tail_outs[idx]
        results.append(jnp.reshape(part, orig_shape))
    return tuple(results)


def pt_module_forward(x):
    """Replicates PtModule.forward on a float array of arbitrary shape."""
    max_tile_rows, vmem_limit = _tile_config()
    return _forward_impl(x,
                         max_tile_rows=max_tile_rows,
                         vmem_limit_bytes=vmem_limit,
                         use_bool_out=_bool_outputs_supported())


def _check(x):
    outs = jax.block_until_ready(pt_module_forward(x))
    ref = (x + 2, x - 3, x * 4, x / 2, x ** 2, x > 1, x < 5, x == 3)
    for got, want in zip(outs, ref):
        assert got.shape == want.shape, (got.shape, want.shape)
        assert got.dtype == want.dtype, (got.dtype, want.dtype)
        if got.dtype == jnp.bool_:
            assert bool(jnp.array_equal(got, want))
        else:
            assert bool(jnp.allclose(got, want))


if __name__ == "__main__":
    key = jax.random.PRNGKey(0)

    # Primary small NCHW input consistent with a typical conv-style module.
    k0, k1, k2 = jax.random.split(key, 3)
    x = jax.random.normal(k0, (2, 4, 16, 16), dtype=jnp.float32) * 3.0
    x = x.at[0, 0, 0, 0].set(3.0)   # exercise the == 3 branch
    _check(x)

    # Ragged shape: exercises the bulk + jnp-tail path (no pad / no slices).
    x_odd = jax.random.normal(k1, (3, 5, 7, 11), dtype=jnp.float32) * 3.0
    _check(x_odd)

    # Larger shape: exercises the multi-tile grid / pipelined / megacore path.
    x_big = jax.random.normal(k2, (8, 16, 64, 64), dtype=jnp.float32) * 3.0
    _check(x_big)

    print("KERNEL_OK")
</pallas_src>

<mosaic_0001>
module attributes {stable_mosaic.version = 11 : i64} {
  func.func @_elementwise_kernel(%arg0: i32, %arg1: memref<32x1024xf32, #tpu.memory_space<vmem>>, %arg2: memref<32x1024xf32, #tpu.memory_space<vmem>>, %arg3: memref<32x1024xf32, #tpu.memory_space<vmem>>, %arg4: memref<32x1024xf32, #tpu.memory_space<vmem>>, %arg5: memref<32x1024xf32, #tpu.memory_space<vmem>>, %arg6: memref<32x1024xf32, #tpu.memory_space<vmem>>, %arg7: memref<32x1024xi32, #tpu.memory_space<vmem>>, %arg8: memref<32x1024xi32, #tpu.memory_space<vmem>>, %arg9: memref<32x1024xi32, #tpu.memory_space<vmem>>) attributes {dimension_semantics = [#tpu.dimension_semantics<arbitrary>], iteration_bounds = array<i64: 2>, scalar_prefetch = 0 : i64, scratch_operands = 0 : i64, tpu.core_type = #tpu.core_type<tc>, window_params = [{transform_indices = @transform_0, window_bounds = array<i64: 32, 1024>}, {transform_indices = @transform_1, window_bounds = array<i64: 32, 1024>}, {transform_indices = @transform_2, window_bounds = array<i64: 32, 1024>}, {transform_indices = @transform_3, window_bounds = array<i64: 32, 1024>}, {transform_indices = @transform_4, window_bounds = array<i64: 32, 1024>}, {transform_indices = @transform_5, window_bounds = array<i64: 32, 1024>}, {transform_indices = @transform_6, window_bounds = array<i64: 32, 1024>}, {transform_indices = @transform_7, window_bounds = array<i64: 32, 1024>}, {transform_indices = @transform_8, window_bounds = array<i64: 32, 1024>}]} {
    %c0 = arith.constant 0 : index
    %c0_0 = arith.constant 0 : index
    %0 = vector.load %arg1[%c0, %c0_0] : memref<32x1024xf32, #tpu.memory_space<vmem>>, vector<32x1024xf32>
    %cst = arith.constant 2.000000e+00 : f32
    %1 = vector.broadcast %cst : f32 to vector<32x1024xf32>
    %2 = arith.addf %0, %1 : vector<32x1024xf32>
    %c0_1 = arith.constant 0 : index
    %c0_2 = arith.constant 0 : index
    %3 = vector.load %arg2[%c0_1, %c0_2] : memref<32x1024xf32, #tpu.memory_space<vmem>>, vector<32x1024xf32>
    tpu.vector_store %arg2[%c0_1, %c0_2], %2 {strides = array<i32>} : memref<32x1024xf32, #tpu.memory_space<vmem>>, vector<32x1024xf32>,
    %cst_3 = arith.constant 3.000000e+00 : f32
    %4 = vector.broadcast %cst_3 : f32 to vector<32x1024xf32>
    %5 = arith.subf %0, %4 : vector<32x1024xf32>
    %c0_4 = arith.constant 0 : index
    %c0_5 = arith.constant 0 : index
    %6 = vector.load %arg3[%c0_4, %c0_5] : memref<32x1024xf32, #tpu.memory_space<vmem>>, vector<32x1024xf32>
    tpu.vector_store %arg3[%c0_4, %c0_5], %5 {strides = array<i32>} : memref<32x1024xf32, #tpu.memory_space<vmem>>, vector<32x1024xf32>,
    %cst_6 = arith.constant 4.000000e+00 : f32
    %7 = vector.broadcast %cst_6 : f32 to vector<32x1024xf32>
    %8 = arith.mulf %0, %7 : vector<32x1024xf32>
    %c0_7 = arith.constant 0 : index
    %c0_8 = arith.constant 0 : index
    %9 = vector.load %arg4[%c0_7, %c0_8] : memref<32x1024xf32, #tpu.memory_space<vmem>>, vector<32x1024xf32>
    tpu.vector_store %arg4[%c0_7, %c0_8], %8 {strides = array<i32>} : memref<32x1024xf32, #tpu.memory_space<vmem>>, vector<32x1024xf32>,
    %cst_9 = arith.constant 5.000000e-01 : f32
    %10 = vector.broadcast %cst_9 : f32 to vector<32x1024xf32>
    %11 = arith.mulf %0, %10 : vector<32x1024xf32>
    %c0_10 = arith.constant 0 : index
    %c0_11 = arith.constant 0 : index
    %12 = vector.load %arg5[%c0_10, %c0_11] : memref<32x1024xf32, #tpu.memory_space<vmem>>, vector<32x1024xf32>
    tpu.vector_store %arg5[%c0_10, %c0_11], %11 {strides = array<i32>} : memref<32x1024xf32, #tpu.memory_space<vmem>>, vector<32x1024xf32>,
    %13 = arith.mulf %0, %0 : vector<32x1024xf32>
    %c0_12 = arith.constant 0 : index
    %c0_13 = arith.constant 0 : index
    %14 = vector.load %arg6[%c0_12, %c0_13] : memref<32x1024xf32, #tpu.memory_space<vmem>>, vector<32x1024xf32>
    tpu.vector_store %arg6[%c0_12, %c0_13], %13 {strides = array<i32>} : memref<32x1024xf32, #tpu.memory_space<vmem>>, vector<32x1024xf32>,
    %cst_14 = arith.constant 1.000000e+00 : f32
    %15 = vector.broadcast %cst_14 : f32 to vector<32x1024xf32>
    %16 = arith.cmpf ogt, %0, %15 : vector<32x1024xf32>
    %c0_15 = arith.constant 0 : index
    %c0_16 = arith.constant 0 : index
    %17 = vector.load %arg7[%c0_15, %c0_16] : memref<32x1024xi32, #tpu.memory_space<vmem>>, vector<32x1024xi32>
    %18 = arith.extui %16 : vector<32x1024xi1> to vector<32x1024xi32>
    %cst_17 = arith.constant dense<0> : vector<32x1024xi32>
    %19 = arith.cmpi ne, %17, %cst_17 : vector<32x1024xi32>
    tpu.vector_store %arg7[%c0_15, %c0_16], %18 {strides = array<i32>} : memref<32x1024xi32, #tpu.memory_space<vmem>>, vector<32x1024xi32>,
    %cst_18 = arith.constant 5.000000e+00 : f32
    %20 = vector.broadcast %cst_18 : f32 to vector<32x1024xf32>
    %21 = arith.cmpf olt, %0, %20 : vector<32x1024xf32>
    %c0_19 = arith.constant 0 : index
    %c0_20 = arith.constant 0 : index
    %22 = vector.load %arg8[%c0_19, %c0_20] : memref<32x1024xi32, #tpu.memory_space<vmem>>, vector<32x1024xi32>
    %23 = arith.extui %21 : vector<32x1024xi1> to vector<32x1024xi32>
    %cst_21 = arith.constant dense<0> : vector<32x1024xi32>
    %24 = arith.cmpi ne, %22, %cst_21 : vector<32x1024xi32>
    tpu.vector_store %arg8[%c0_19, %c0_20], %23 {strides = array<i32>} : memref<32x1024xi32, #tpu.memory_space<vmem>>, vector<32x1024xi32>,
    %cst_22 = arith.constant 3.000000e+00 : f32
    %25 = vector.broadcast %cst_22 : f32 to vector<32x1024xf32>
    %26 = arith.cmpf oeq, %0, %25 : vector<32x1024xf32>
    %c0_23 = arith.constant 0 : index
    %c0_24 = arith.constant 0 : index
    %27 = vector.load %arg9[%c0_23, %c0_24] : memref<32x1024xi32, #tpu.memory_space<vmem>>, vector<32x1024xi32>
    %28 = arith.extui %26 : vector<32x1024xi1> to vector<32x1024xi32>
    %cst_25 = arith.constant dense<0> : vector<32x1024xi32>
    %29 = arith.cmpi ne, %27, %cst_25 : vector<32x1024xi32>
    tpu.vector_store %arg9[%c0_23, %c0_24], %28 {strides = array<i32>} : memref<32x1024xi32, #tpu.memory_space<vmem>>, vector<32x1024xi32>,
    return
  }
  func.func @transform_0(%arg0: i32) -> (i32, i32) {
    %c0_i32 = arith.constant 0 : i32
    %c0_i32_0 = arith.constant 0 : i32
    return %arg0, %c0_i32 : i32, i32
  }
  func.func @transform_1(%arg0: i32) -> (i32, i32) {
    %c0_i32 = arith.constant 0 : i32
    %c0_i32_0 = arith.constant 0 : i32
    return %arg0, %c0_i32 : i32, i32
  }
  func.func @transform_2(%arg0: i32) -> (i32, i32) {
    %c0_i32 = arith.constant 0 : i32
    %c0_i32_0 = arith.constant 0 : i32
    return %arg0, %c0_i32 : i32, i32
  }
  func.func @transform_3(%arg0: i32) -> (i32, i32) {
    %c0_i32 = arith.constant 0 : i32
    %c0_i32_0 = arith.constant 0 : i32
    return %arg0, %c0_i32 : i32, i32
  }
  func.func @transform_4(%arg0: i32) -> (i32, i32) {
    %c0_i32 = arith.constant 0 : i32
    %c0_i32_0 = arith.constant 0 : i32
    return %arg0, %c0_i32 : i32, i32
  }
  func.func @transform_5(%arg0: i32) -> (i32, i32) {
    %c0_i32 = arith.constant 0 : i32
    %c0_i32_0 = arith.constant 0 : i32
    return %arg0, %c0_i32 : i32, i32
  }
  func.func @transform_6(%arg0: i32) -> (i32, i32) {
    %c0_i32 = arith.constant 0 : i32
    %c0_i32_0 = arith.constant 0 : i32
    return %arg0, %c0_i32 : i32, i32
  }
  func.func @transform_7(%arg0: i32) -> (i32, i32) {
    %c0_i32 = arith.constant 0 : i32
    %c0_i32_0 = arith.constant 0 : i32
    return %arg0, %c0_i32 : i32, i32
  }
  func.func @transform_8(%arg0: i32) -> (i32, i32) {
    %c0_i32 = arith.constant 0 : i32
    %c0_i32_0 = arith.constant 0 : i32
    return %arg0, %c0_i32 : i32, i32
  }
}

module attributes {stable_mosaic.version = 11 : i64} {
  func.func @_elementwise_kernel(%arg0: i32, %arg1: memref<2x1024xf32, #tpu.memory_space<vmem>>, %arg2: memref<2x1024xf32, #tpu.memory_space<vmem>>, %arg3: memref<2x1024xf32, #tpu.memory_space<vmem>>, %arg4: memref<2x1024xf32, #tpu.memory_space<vmem>>, %arg5: memref<2x1024xf32, #tpu.memory_space<vmem>>, %arg6: memref<2x1024xf32, #tpu.memory_space<vmem>>, %arg7: memref<2x1024xi8, #tpu.memory_space<vmem>>, %arg8: memref<2x1024xi8, #tpu.memory_space<vmem>>, %arg9: memref<2x1024xi8, #tpu.memory_space<vmem>>) attributes {dimension_semantics = [#tpu.dimension_semantics<parallel>], iteration_bounds = array<i64: 1>, scalar_prefetch = 0 : i64, scratch_operands = 0 : i64, tpu.core_type = #tpu.core_type<tc>, window_params = [{transform_indices = @transform_0, window_bounds = array<i64: 2, 1024>}, {transform_indices = @transform_1, window_bounds = array<i64: 2, 1024>}, {transform_indices = @transform_2, window_bounds = array<i64: 2, 1024>}, {transform_indices = @transform_3, window_bounds = array<i64: 2, 1024>}, {transform_indices = @transform_4, window_bounds = array<i64: 2, 1024>}, {transform_indices = @transform_5, window_bounds = array<i64: 2, 1024>}, {transform_indices = @transform_6, window_bounds = array<i64: 2, 1024>}, {transform_indices = @transform_7, window_bounds = array<i64: 2, 1024>}, {transform_indices = @transform_8, window_bounds = array<i64: 2, 1024>}]} {
    %c0 = arith.constant 0 : index
    %c0_0 = arith.constant 0 : index
    %0 = vector.load %arg1[%c0, %c0_0] : memref<2x1024xf32, #tpu.memory_space<vmem>>, vector<2x1024xf32>
    %cst = arith.constant 2.000000e+00 : f32
    %1 = vector.broadcast %cst : f32 to vector<2x1024xf32>
    %2 = arith.addf %0, %1 : vector<2x1024xf32>
    %c0_1 = arith.constant 0 : index
    %c0_2 = arith.constant 0 : index
    %3 = vector.load %arg2[%c0_1, %c0_2] : memref<2x1024xf32, #tpu.memory_space<vmem>>, vector<2x1024xf32>
    tpu.vector_store %arg2[%c0_1, %c0_2], %2 {strides = array<i32>} : memref<2x1024xf32, #tpu.memory_space<vmem>>, vector<2x1024xf32>,
    %cst_3 = arith.constant 3.000000e+00 : f32
    %4 = vector.broadcast %cst_3 : f32 to vector<2x1024xf32>
    %5 = arith.subf %0, %4 : vector<2x1024xf32>
    %c0_4 = arith.constant 0 : index
    %c0_5 = arith.constant 0 : index
    %6 = vector.load %arg3[%c0_4, %c0_5] : memref<2x1024xf32, #tpu.memory_space<vmem>>, vector<2x1024xf32>
    tpu.vector_store %arg3[%c0_4, %c0_5], %5 {strides = array<i32>} : memref<2x1024xf32, #tpu.memory_space<vmem>>, vector<2x1024xf32>,
    %cst_6 = arith.constant 4.000000e+00 : f32
    %7 = vector.broadcast %cst_6 : f32 to vector<2x1024xf32>
    %8 = arith.mulf %0, %7 : vector<2x1024xf32>
    %c0_7 = arith.constant 0 : index
    %c0_8 = arith.constant 0 : index
    %9 = vector.load %arg4[%c0_7, %c0_8] : memref<2x1024xf32, #tpu.memory_space<vmem>>, vector<2x1024xf32>
    tpu.vector_store %arg4[%c0_7, %c0_8], %8 {strides = array<i32>} : memref<2x1024xf32, #tpu.memory_space<vmem>>, vector<2x1024xf32>,
    %cst_9 = arith.constant 5.000000e-01 : f32
    %10 = vector.broadcast %cst_9 : f32 to vector<2x1024xf32>
    %11 = arith.mulf %0, %10 : vector<2x1024xf32>
    %c0_10 = arith.constant 0 : index
    %c0_11 = arith.constant 0 : index
    %12 = vector.load %arg5[%c0_10, %c0_11] : memref<2x1024xf32, #tpu.memory_space<vmem>>, vector<2x1024xf32>
    tpu.vector_store %arg5[%c0_10, %c0_11], %11 {strides = array<i32>} : memref<2x1024xf32, #tpu.memory_space<vmem>>, vector<2x1024xf32>,
    %13 = arith.mulf %0, %0 : vector<2x1024xf32>
    %c0_12 = arith.constant 0 : index
    %c0_13 = arith.constant 0 : index
    %14 = vector.load %arg6[%c0_12, %c0_13] : memref<2x1024xf32, #tpu.memory_space<vmem>>, vector<2x1024xf32>
    tpu.vector_store %arg6[%c0_12, %c0_13], %13 {strides = array<i32>} : memref<2x1024xf32, #tpu.memory_space<vmem>>, vector<2x1024xf32>,
    %cst_14 = arith.constant 1.000000e+00 : f32
    %15 = vector.broadcast %cst_14 : f32 to vector<2x1024xf32>
    %16 = arith.cmpf ogt, %0, %15 : vector<2x1024xf32>
    %17 = arith.extui %16 : vector<2x1024xi1> to vector<2x1024xi8>
    %c0_15 = arith.constant 0 : index
    %c0_16 = arith.constant 0 : index
    %18 = vector.load %arg7[%c0_15, %c0_16] : memref<2x1024xi8, #tpu.memory_space<vmem>>, vector<2x1024xi8>
    tpu.vector_store %arg7[%c0_15, %c0_16], %17 {strides = array<i32>} : memref<2x1024xi8, #tpu.memory_space<vmem>>, vector<2x1024xi8>,
    %cst_17 = arith.constant 5.000000e+00 : f32
    %19 = vector.broadcast %cst_17 : f32 to vector<2x1024xf32>
    %20 = arith.cmpf olt, %0, %19 : vector<2x1024xf32>
    %21 = arith.extui %20 : vector<2x1024xi1> to vector<2x1024xi8>
    %c0_18 = arith.constant 0 : index
    %c0_19 = arith.constant 0 : index
    %22 = vector.load %arg8[%c0_18, %c0_19] : memref<2x1024xi8, #tpu.memory_space<vmem>>, vector<2x1024xi8>
    tpu.vector_store %arg8[%c0_18, %c0_19], %21 {strides = array<i32>} : memref<2x1024xi8, #tpu.memory_space<vmem>>, vector<2x1024xi8>,
    %cst_20 = arith.constant 3.000000e+00 : f32
    %23 = vector.broadcast %cst_20 : f32 to vector<2x1024xf32>
    %24 = arith.cmpf oeq, %0, %23 : vector<2x1024xf32>
    %25 = arith.extui %24 : vector<2x1024xi1> to vector<2x1024xi8>
    %c0_21 = arith.constant 0 : index
    %c0_22 = arith.constant 0 : index
    %26 = vector.load %arg9[%c0_21, %c0_22] : memref<2x1024xi8, #tpu.memory_space<vmem>>, vector<2x1024xi8>
    tpu.vector_store %arg9[%c0_21, %c0_22], %25 {strides = array<i32>} : memref<2x1024xi8, #tpu.memory_space<vmem>>, vector<2x1024xi8>,
    return
  }
  func.func @transform_0(%arg0: i32) -> (i32, i32) {
    %c0_i32 = arith.constant 0 : i32
    %c0_i32_0 = arith.constant 0 : i32
    return %arg0, %c0_i32 : i32, i32
  }
  func.func @transform_1(%arg0: i32) -> (i32, i32) {
    %c0_i32 = arith.constant 0 : i32
    %c0_i32_0 = arith.constant 0 : i32
    return %arg0, %c0_i32 : i32, i32
  }
  func.func @transform_2(%arg0: i32) -> (i32, i32) {
    %c0_i32 = arith.constant 0 : i32
    %c0_i32_0 = arith.constant 0 : i32
    return %arg0, %c0_i32 : i32, i32
  }
  func.func @transform_3(%arg0: i32) -> (i32, i32) {
    %c0_i32 = arith.constant 0 : i32
    %c0_i32_0 = arith.constant 0 : i32
    return %arg0, %c0_i32 : i32, i32
  }
  func.func @transform_4(%arg0: i32) -> (i32, i32) {
    %c0_i32 = arith.constant 0 : i32
    %c0_i32_0 = arith.constant 0 : i32
    return %arg0, %c0_i32 : i32, i32
  }
  func.func @transform_5(%arg0: i32) -> (i32, i32) {
    %c0_i32 = arith.constant 0 : i32
    %c0_i32_0 = arith.constant 0 : i32
    return %arg0, %c0_i32 : i32, i32
  }
  func.func @transform_6(%arg0: i32) -> (i32, i32) {
    %c0_i32 = arith.constant 0 : i32
    %c0_i32_0 = arith.constant 0 : i32
    return %arg0, %c0_i32 : i32, i32
  }
  func.func @transform_7(%arg0: i32) -> (i32, i32) {
    %c0_i32 = arith.constant 0 : i32
    %c0_i32_0 = arith.constant 0 : i32
    return %arg0, %c0_i32 : i32, i32
  }
  func.func @transform_8(%arg0: i32) -> (i32, i32) {
    %c0_i32 = arith.constant 0 : i32
    %c0_i32_0 = arith.constant 0 : i32
    return %arg0, %c0_i32 : i32, i32
  }
}

</mosaic_0001>

<bundles_post_ra>
// kernel: tpu_custom_call.1
= control target key start
LH: loop header
LB: loop body
LE: loop exit
PB: predicated region body
PF: predicated region fallthrough
CT: control target
= control target key end

     0   :  { %s2947_s0 = inlined_call_operand.hbm [shape: f32[64,1024], index: 0, kind: input, shape index: {}]   ;;  %s2948_s1 = inlined_call_operand.hbm [shape: f32[64,1024], index: 1, kind: output, shape index: {0}]   ;;  %s2949_s2 = inlined_call_operand.hbm [shape: f32[64,1024], index: 2, kind: output, shape index: {1}]   ;;  %s2950_s3 = inlined_call_operand.hbm [shape: f32[64,1024], index: 3, kind: output, shape index: {2}]   ;;  %s2951_s4 = inlined_call_operand.hbm [shape: f32[64,1024], index: 4, kind: output, shape index: {3}]   ;;  %s2952_s5 = inlined_call_operand.hbm [shape: f32[64,1024], index: 5, kind: output, shape index: {4}]   ;;  %s2953_s6 = inlined_call_operand.vmem [shape: s32[64,1024], index: 6, kind: output, shape index: {5}]   ;;  %s2954_s7 = inlined_call_operand.vmem [shape: s32[64,1024], index: 7, kind: output, shape index: {6}]   ;;  %s2955_s8 = inlined_call_operand.vmem [shape: s32[64,1024], index: 8, kind: output, shape index: {7}]  }
   0x1   :  { %2967 = sst [smem:[#allocation22_spill]] %s2947_s0 }
   0x2   :  { %2968 = sst [smem:[#allocation23_spill]] %s2953_s6 }
   0x3   :  { %2969 = sst [smem:[#allocation24_spill]] %s2954_s7 }
   0x4   :  { %2970 = sst [smem:[#allocation25_spill]] %s2955_s8 }
   0x5   :  { %14 = vsyncpa [#allocation3], 0 }
   0x6   :  { %16 = vsyncpa [#allocation3 + $0x1], 0 }
   0x7   :  { %17 = vsyncpa [#allocation4], 0 }
   0x8   :  { %19 = vsyncpa [#allocation4 + $0x1], 0 }
   0x9   :  { %20 = vsyncpa [#allocation7], 0 }
   0xa   :  { %22 = vsyncpa [#allocation7 + $0x1], 0 }
   0xb   :  { %23 = vsyncpa [#allocation10], 0 }
   0xc   :  { %25 = vsyncpa [#allocation10 + $0x1], 0  ;;  %s1900_s27 = smov 0   ;;  %s1902_s28 = smov 0  }
   0xd   :  { %s1904_s29 = smov 0   ;;  %s1906_s30 = smov 0  }
   0xe LB: > { %2971 = sst [smem:[#allocation16_spill]] %s1840_s28  ;;  %s1921_s9 = sadd.s32 4294967295, %s1848_s30   ;;  %s1848_s30 = sphi %s1906_s30, %s2995_s30   ;;  %s1844_s29 = sphi %s1904_s29, %s2998_s29   ;;  %s1840_s28 = sphi %s1902_s28, %s2997_s28   ;;  %s1836_s27 = sphi %s1900_s27, %s2996_s27  }
   0xf   : > { %2972 = sst [smem:[#allocation17_spill]] %s1844_s29  ;;  %s2956_s10 = sadd.s32 4294967294, %s1848_s30  }
  0x10   : > { %2973 = sst [smem:[#allocation18_spill]] %s1848_s30  ;;  %s1925_s11 = sadd.s32 1, %s1848_s30  }
  0x11   : > { %2974 = sst [smem:[#allocation19_spill]] %s1925_s11  ;;  %s38_s12 = sadd.s32 1, %s1844_s29 }
  0x12   : > { %s35_s13 = ssub.s32 %s1848_s30, %s1925_s11  ;;  %p45_p0 = scmp.ne.s32.totalorder %s1844_s29, %s1840_s28 }
  0x13   : > { %p36_p1 = scmp.eq.s32.totalorder %s35_s13, 0  ;;  %p46_p2 = scmp.eq.s32.totalorder %s1848_s30, 0 }
  0x14   : > { %p51_p3 = scmp.ne.s32.totalorder %s1840_s28, %s1836_s27  ;;  %p52_p4 = scmp.eq.s32.totalorder %s1921_s9, 0 }
  0x15   : > { %s1937_s14 = scalar_select %p36_p1, %s1844_s29, %s38_s12  }
  0x16   : > { %p1939_p5 = por %p46_p2, %p45_p0  ;;  %p1943_p6 = por %p52_p4, %p51_p3 }
  0x17   : > { %2975 = sst [smem:[#allocation20_spill]] %s1937_s14  ;;  %p75_p7 = scmp.eq.s32.totalorder %s1921_s9, 1 }
  0x18   : > { %p81_p8 = scmp.eq.s32.totalorder %s2956_s10, 1  ;;  %p1593_p10 = scmp.lt.s32.totalorder %s1848_s30, 2 }
  0x19   : > { %p1952_p11 = por %p75_p7, %p45_p0  ;;  %s283_s19 = sand.u32 1, %s1844_s29  }
  0x1a   : > { %p1956_p12 = por %p81_p8, %p51_p3  ;;  %s1547_s20 = sshll.u32 %s1848_s30, 8 }
  0x1b   : > { %s1472_s21 = sshll.u32 %s283_s19, 8  ;;  %s2980_s0 = sld [smem:[#allocation22_spill]] }
  0x1c   : > { %s287_s26 = scalar_lea.vmem [#allocation2], %s1472_s21  ;;  %p1967_p13 = pnand %p1593_p10, %p1939_p5 }
  0x1d   : > { %s296_s12 = sshll.u32 %s287_s26, 4  ;;  %p1476_p0 = scmp.ge.s32.totalorder %s1848_s30, 1  ;;  %s297_s12 = int_to_ptr.vmem [resolvable:$true] %s296_s12 }
  0x1e   : > { %p304_p1 = scmp.lt.s32.totalorder %s1848_s30, 3  ;;  %s284_s10 = scalar_lea.sflag [#allocation3], %s283_s19 }
  0x1f   : > { %p1636_p3 = pneg %p1967_p13 }
  0x21   : > { %s293_s24 = scalar_lea.hbm %s2980_s0, %s1547_s20  ;;  %s1639_s15 = scalar_lea.hbm %s2980_s0, 512 }
  0x22   : > { %s294_s25 = sshll.u32 %s293_s24, 4  ;;  %s295_s25 = int_to_ptr.hbm [resolvable:$true] %s294_s25 }
  0x23   : > { %s1632_s14 = sshra.s32 %s295_s25, 4  ;;  %s1633_s14 = int_to_ptr.hbm [resolvable:$true] %s1632_s14 }
  0x24   : > { %s1634_s29 = scalar_lea.hbm %s1633_s14, 256  ;;  %p1640_p5 = scmp.lt.s32.totalorder %s1633_s14, %s2980_s0 }
  0x25   : > { %p1635_p2 = scmp.ne.s32.totalorder %s1633_s14, %s1634_s29  ;;  %p1641_p8 = scmp.lt.s32.totalorder %s1639_s15, %s1634_s29 }
  0x27   : > { %p1637_p4 = pnand %p1636_p3, %p1635_p2  ;;  %p1642_p10 = por %p1641_p8, %p1640_p5 }
  0x29   : > { %p1638_p7 = pneg %p1637_p4 }
  0x2b   : > { %p1643_p9 = pnand %p1642_p10, %p1638_p7 }
  0x2d   : > { %1646 = shalt.err (!%p1643_p9)
}
  0x2e   : > { %s1850_s19 = smov 1024   ;;  %s1851_s24 = smov 64  }
  0x2f   : > { %1576 = dma.hbm_to_vmem [thread:$0]  (!%p1967_p13), %s295_s25, 4096, %s297_s12, %s284_s10, %s1850_s19, %s1850_s19, %s1851_s24  }
  0x30   : > { %p305_p2 = pnand %p1476_p0, %p304_p1 }
  0x32   : > { %308 = sbr.rel (%p305_p2) target bundleno = 368 (0x170), region = 24 }
  0x37   : > { %s1988_s26 = sand.u32 1, %s1840_s28  }
  0x38   : > { %s1991_s29 = sshll.u32 %s1988_s26, 8  ;;  %s311_s14 = scalar_lea.sflag [#allocation3], %s1988_s26 }
  0x39   : > { %s1995_s20 = scalar_lea.vmem [#allocation2], %s1991_s29 }
  0x3a   : > { %1819 = dma.done.wait (%p1943_p6), %s311_s14, 4096  }
  0x3b   : > { %1821 = vsyncadd (%p1943_p6), %s311_s14, 4294963200  ;;  %s1483_s10 = sshll.u32 %s1921_s9, 2  ;;  %s2982_s6 = sld [smem:[#allocation23_spill]]  ;;  %v2011_v0 = vld [vmem:[%s1995_s20] sm:$0xff]  ;;  %v2014_v1 = vld [vmem:[%s1995_s20 + $0x8] sm:$0xff]  ;;  %v1852_v6 = vmov 0  }
  0x3c   : > { %p393_p9 = scmp.lt.s32.totalorder %s1483_s10, 7  ;;  %v2017_v2 = vld [vmem:[%s1995_s20 + $0x10] sm:$0xff]  ;;  %vm765_vm0 = vcmp.gt.f32.partialorder %v2011_v0, 1.0  ;;  %vm766_vm1 = vcmp.gt.f32.partialorder %v2014_v1, 1.0  ;;  %v2023_v3 = vld [vmem:[%s1995_s20 + $0x18] sm:$0xff]  ;;  %v2026_v4 = vld [vmem:[%s1995_s20 + $0x20] sm:$0xff] }
  0x3d   : > { %vm767_vm2 = vcmp.gt.f32.partialorder %v2017_v2, 1.0  ;;  %v2029_v5 = vld [vmem:[%s1995_s20 + $0x28] sm:$0xff]  ;;  %v797_v7 = vsel %vm765_vm0, 1, %v1852_v6  ;;  %v798_v8 = vsel %vm766_vm1, 1, %v1852_v6  ;;  %vm768_vm3 = vcmp.gt.f32.partialorder %v2023_v3, 1.0  ;;  %v2036_v10 = vld [vmem:[%s1995_s20 + $0x30] sm:$0xff] }
  0x3e   : > { %s3000_s10 = smov (!%p393_p9, %s1483_s10), 7  ;;  %v799_v9 = vsel %vm767_vm2, 1, %v1852_v6  ;;  %v2039_v11 = vld [vmem:[%s1995_s20 + $0x38] sm:$0xff]  ;;  %v800_v12 = vsel %vm768_vm3, 1, %v1852_v6  ;;  %vm769_vm4 = vcmp.gt.f32.partialorder %v2026_v4, 1.0  ;;  %vm770_vm5 = vcmp.gt.f32.partialorder %v2029_v5, 1.0 }
  0x3f   : > { %s2002_s25 = sshll.u32 %s3000_s10, 6  ;;  %vm771_vm6 = vcmp.gt.f32.partialorder %v2036_v10, 1.0  ;;  %v801_v13 = vsel %vm769_vm4, 1, %v1852_v6  ;;  %vm772_vm7 = vcmp.gt.f32.partialorder %v2039_v11, 1.0  ;;  %v802_v14 = vsel %vm770_vm5, 1, %v1852_v6  ;;  %s2983_s7 = sld [smem:[#allocation24_spill]] }
  0x40   : > { %vm861_vm8 = vcmp.lt.f32.partialorder %v2011_v0, 5.0  ;;  %v803_v15 = vsel %vm771_vm6, 1, %v1852_v6  ;;  %vm862_vm9 = vcmp.lt.f32.partialorder %v2014_v1, 5.0  ;;  %v804_v16 = vsel %vm772_vm7, 1, %v1852_v6  ;;  %s2984_s8 = sld [smem:[#allocation25_spill]]  ;;  %s2123_s14 = scalar_lea.vmem [#allocation6], %s1991_s29 }
  0x41   : > { %s2008_s21 = scalar_lea.vmem %s2982_s6, %s2002_s25  ;;  %vm863_vm10 = vcmp.lt.f32.partialorder %v2017_v2, 5.0  ;;  %v893_v17 = vsel %vm861_vm8, 1, %v1852_v6  ;;  %vm864_vm11 = vcmp.lt.f32.partialorder %v2023_v3, 5.0  ;;  %v894_v18 = vsel %vm862_vm9, 1, %v1852_v6  ;;  %v2130_v39 = vld [vmem:[%s1995_s20 + $0x40] sm:$0xff]  ;;  %v2135_v41 = vld [vmem:[%s1995_s20 + $0x48] sm:$0xff] }
  0x42   : > { %829 = vst [vmem:[%s2008_s21] sm:$0xff] %v797_v7  ;;  %vm865_vm12 = vcmp.lt.f32.partialorder %v2026_v4, 5.0  ;;  %v895_v19 = vsel %vm863_vm10, 1, %v1852_v6  ;;  %vm866_vm13 = vcmp.lt.f32.partialorder %v2029_v5, 5.0  ;;  %v896_v20 = vsel %vm864_vm11, 1, %v1852_v6  ;;  %v2140_v43 = vld [vmem:[%s1995_s20 + $0x50] sm:$0xff]  ;;  %v2145_v45 = vld [vmem:[%s1995_s20 + $0x58] sm:$0xff] }
  0x43   : > { %830 = vst [vmem:[%s2008_s21 + $0x8] sm:$0xff] %v798_v8  ;;  %vm867_vm14 = vcmp.lt.f32.partialorder %v2036_v10, 5.0  ;;  %v897_v21 = vsel %vm865_vm12, 1, %v1852_v6  ;;  %vm868_vm15 = vcmp.lt.f32.partialorder %v2039_v11, 5.0  ;;  %v898_v22 = vsel %vm866_vm13, 1, %v1852_v6  ;;  %v2150_v47 = vld [vmem:[%s1995_s20 + $0x60] sm:$0xff] }
  0x44   : > { %831 = vst [vmem:[%s2008_s21 + $0x10] sm:$0xff] %v799_v9  ;;  %vm957_vm0 = vcmp.eq.f32.partialorder %v2011_v0, 3.0  ;;  %v899_v23 = vsel %vm867_vm14, 1, %v1852_v6  ;;  %vm958_vm1 = vcmp.eq.f32.partialorder %v2014_v1, 3.0  ;;  %v900_v24 = vsel %vm868_vm15, 1, %v1852_v6  ;;  %v2155_v49 = vld [vmem:[%s1995_s20 + $0x68] sm:$0xff] }
  0x45   : > { %832 = vst [vmem:[%s2008_s21 + $0x18] sm:$0xff] %v800_v12  ;;  %s2063_s22 = scalar_lea.vmem %s2983_s7, %s2002_s25  ;;  %vm959_vm2 = vcmp.eq.f32.partialorder %v2017_v2, 3.0  ;;  %v989_v25 = vsel %vm957_vm0, 1, %v1852_v6  ;;  %vm960_vm3 = vcmp.eq.f32.partialorder %v2023_v3, 3.0  ;;  %v990_v26 = vsel %vm958_vm1, 1, %v1852_v6  ;;  %v2160_v51 = vld [vmem:[%s1995_s20 + $0x70] sm:$0xff] }
  0x46   : > { %833 = vst [vmem:[%s2008_s21 + $0x20] sm:$0xff] %v801_v13  ;;  %s2093_s24 = scalar_lea.vmem %s2984_s8, %s2002_s25  ;;  %vm961_vm4 = vcmp.eq.f32.partialorder %v2026_v4, 3.0  ;;  %v991_v27 = vsel %vm959_vm2, 1, %v1852_v6  ;;  %vm962_vm5 = vcmp.eq.f32.partialorder %v2029_v5, 3.0  ;;  %v992_v28 = vsel %vm960_vm3, 1, %v1852_v6  ;;  %v2165_v53 = vld [vmem:[%s1995_s20 + $0x78] sm:$0xff] }
  0x47   : > { %834 = vst [vmem:[%s2008_s21 + $0x28] sm:$0xff] %v802_v14  ;;  %vm963_vm6 = vcmp.eq.f32.partialorder %v2036_v10, 3.0  ;;  %v993_v29 = vsel %vm961_vm4, 1, %v1852_v6  ;;  %vm964_vm7 = vcmp.eq.f32.partialorder %v2039_v11, 3.0  ;;  %v994_v30 = vsel %vm962_vm5, 1, %v1852_v6  ;;  %v2170_v55 = vld [vmem:[%s1995_s20 + $0x80] sm:$0xff] }
  0x48   : > { %835 = vst [vmem:[%s2008_s21 + $0x30] sm:$0xff] %v803_v15  ;;  %v995_v31 = vsel %vm963_vm6, 1, %v1852_v6  ;;  %v996_v32 = vsel %vm964_vm7, 1, %v1852_v6  ;;  %v1492_v33 = vadd.f32 -3.0, %v2011_v0  ;;  %v1493_v34 = vadd.f32 -3.0, %v2014_v1  ;;  %v2175_v57 = vld [vmem:[%s1995_s20 + $0x88] sm:$0xff] }
  0x49   : > { %836 = vst [vmem:[%s2008_s21 + $0x38] sm:$0xff] %v804_v16  ;;  %v1494_v35 = vadd.f32 -3.0, %v2017_v2  ;;  %v1495_v36 = vadd.f32 -3.0, %v2023_v3  ;;  %v1496_v37 = vadd.f32 -3.0, %v2026_v4  ;;  %v1497_v38 = vadd.f32 -3.0, %v2029_v5  ;;  %v2180_v59 = vld [vmem:[%s1995_s20 + $0x90] sm:$0xff] }
  0x4a   : > { %925 = vst [vmem:[%s2063_s22] sm:$0xff] %v893_v17  ;;  %v1498_v40 = vadd.f32 -3.0, %v2036_v10  ;;  %v1499_v42 = vadd.f32 -3.0, %v2039_v11  ;;  %v1500_v44 = vadd.f32 -3.0, %v2130_v39  ;;  %v1501_v46 = vadd.f32 -3.0, %v2135_v41  ;;  %v2185_v61 = vld [vmem:[%s1995_s20 + $0x98] sm:$0xff]  ;;  %v2190_v63 = vld [vmem:[%s1995_s20 + $0xa0] sm:$0xff] }
  0x4b   : > { %926 = vst [vmem:[%s2063_s22 + $0x8] sm:$0xff] %v894_v18  ;;  %v1502_v48 = vadd.f32 -3.0, %v2140_v43  ;;  %v1503_v50 = vadd.f32 -3.0, %v2145_v45  ;;  %v1504_v52 = vadd.f32 -3.0, %v2150_v47  ;;  %v1505_v54 = vadd.f32 -3.0, %v2155_v49  ;;  %v2195_v8 = vld [vmem:[%s1995_s20 + $0xa8] sm:$0xff] }
  0x4c   : > { %927 = vst [vmem:[%s2063_s22 + $0x10] sm:$0xff] %v895_v19  ;;  %v1506_v56 = vadd.f32 -3.0, %v2160_v51  ;;  %v1507_v58 = vadd.f32 -3.0, %v2165_v53  ;;  %v1508_v60 = vadd.f32 -3.0, %v2170_v55  ;;  %v1509_v62 = vadd.f32 -3.0, %v2175_v57  ;;  %v2200_v12 = vld [vmem:[%s1995_s20 + $0xb0] sm:$0xff] }
  0x4d   : > { %928 = vst [vmem:[%s2063_s22 + $0x18] sm:$0xff] %v896_v20  ;;  %v1510_v7 = vadd.f32 -3.0, %v2180_v59  ;;  %v1511_v9 = vadd.f32 -3.0, %v2185_v61  ;;  %v1512_v13 = vadd.f32 -3.0, %v2190_v63  ;;  %v2205_v14 = vld [vmem:[%s1995_s20 + $0xb8] sm:$0xff]  ;;  %v1513_v15 = vadd.f32 -3.0, %v2195_v8 }
  0x4e   : > { %929 = vst [vmem:[%s2063_s22 + $0x20] sm:$0xff] %v897_v21  ;;  %v2210_v16 = vld [vmem:[%s1995_s20 + $0xc0] sm:$0xff]  ;;  %v1514_v17 = vadd.f32 -3.0, %v2200_v12  ;;  %v2215_v18 = vld [vmem:[%s1995_s20 + $0xc8] sm:$0xff]  ;;  %v1515_v19 = vadd.f32 -3.0, %v2205_v14  ;;  %v2220_v20 = vld [vmem:[%s1995_s20 + $0xd0] sm:$0xff] }
  0x4f   : > { %930 = vst [vmem:[%s2063_s22 + $0x28] sm:$0xff] %v898_v22  ;;  %v1516_v21 = vadd.f32 -3.0, %v2210_v16  ;;  %v2225_v22 = vld [vmem:[%s1995_s20 + $0xd8] sm:$0xff]  ;;  %vm773_vm8 = vcmp.gt.f32.partialorder %v2130_v39, 1.0  ;;  %vm774_vm9 = vcmp.gt.f32.partialorder %v2135_v41, 1.0  ;;  %vm775_vm10 = vcmp.gt.f32.partialorder %v2140_v43, 1.0 }
  0x50   : > { %931 = vst [vmem:[%s2063_s22 + $0x30] sm:$0xff] %v899_v23  ;;  %v1517_v23 = vadd.f32 -3.0, %v2215_v18  ;;  %vm776_vm11 = vcmp.gt.f32.partialorder %v2145_v45, 1.0  ;;  %vm777_vm12 = vcmp.gt.f32.partialorder %v2150_v47, 1.0  ;;  %vm778_vm13 = vcmp.gt.f32.partialorder %v2155_v49, 1.0  ;;  %s2401_s10 = scalar_lea.vmem [#allocation5], %s1991_s29 }
  0x51   : > { %932 = vst [vmem:[%s2063_s22 + $0x38] sm:$0xff] %v900_v24  ;;  %v2230_v24 = vld [vmem:[%s1995_s20 + $0xe0] sm:$0xff]  ;;  %vm779_vm14 = vcmp.gt.f32.partialorder %v2160_v51, 1.0  ;;  %vm780_vm15 = vcmp.gt.f32.partialorder %v2165_v53, 1.0  ;;  %vm869_vm0 = vcmp.lt.f32.partialorder %v2130_v39, 5.0  ;;  %vm870_vm1 = vcmp.lt.f32.partialorder %v2135_v41, 5.0 }
  0x52   : > { %1021 = vst [vmem:[%s2093_s24] sm:$0xff] %v989_v25  ;;  %v1518_v25 = vadd.f32 -3.0, %v2220_v20  ;;  %vm871_vm2 = vcmp.lt.f32.partialorder %v2140_v43, 5.0  ;;  %vm872_vm3 = vcmp.lt.f32.partialorder %v2145_v45, 5.0  ;;  %vm873_vm4 = vcmp.lt.f32.partialorder %v2150_v47, 5.0  ;;  %s2468_s25 = scalar_lea.vmem [#allocation8], %s1991_s29  ;;  %s2539_s12 = scalar_lea.vmem [#allocation11], %s1991_s29 }
  0x53   : > { %1022 = vst [vmem:[%s2093_s24 + $0x8] sm:$0xff] %v990_v26  ;;  %v2235_v26 = vld [vmem:[%s1995_s20 + $0xe8] sm:$0xff]  ;;  %vm874_vm5 = vcmp.lt.f32.partialorder %v2155_v49, 5.0  ;;  %vm875_vm6 = vcmp.lt.f32.partialorder %v2160_v51, 5.0  ;;  %vm876_vm7 = vcmp.lt.f32.partialorder %v2165_v53, 5.0  ;;  %s1123_s6 = sshll.u32 %s2123_s14, 4  ;;  %s2716_s6 = int_to_ptr.vmem [resolvable:$true] %s1123_s6 }
  0x54   : > { %1023 = vst [vmem:[%s2093_s24 + $0x10] sm:$0xff] %v991_v27  ;;  %v1519_v27 = vadd.f32 -3.0, %v2225_v22 }
  0x55   : > { %1024 = vst [vmem:[%s2093_s24 + $0x18] sm:$0xff] %v992_v28  ;;  %v2240_v28 = vld [vmem:[%s1995_s20 + $0xf0] sm:$0xff] }
  0x56   : > { %1025 = vst [vmem:[%s2093_s24 + $0x20] sm:$0xff] %v993_v29  ;;  %v1520_v29 = vadd.f32 -3.0, %v2230_v24 }
  0x57   : > { %1026 = vst [vmem:[%s2093_s24 + $0x28] sm:$0xff] %v994_v30  ;;  %v2245_v30 = vld [vmem:[%s1995_s20 + $0xf8] sm:$0xff]  ;;  %s2262_s20 = scalar_lea.vmem [#allocation9], %s1991_s29  ;;  %s2678_s29 = sshll.u32 %s1921_s9, 8 }
  0x58   : > { %1027 = vst [vmem:[%s2093_s24 + $0x30] sm:$0xff] %v995_v31  ;;  %v1521_v31 = vadd.f32 -3.0, %v2235_v26  ;;  %s1122_s23 = scalar_lea.hbm %s2949_s2, %s2678_s29  ;;  %s1158_s13 = scalar_lea.hbm %s2951_s4, %s2678_s29 }
  0x59   : > { %1028 = vst [vmem:[%s2093_s24 + $0x38] sm:$0xff] %v996_v32  ;;  %v1522_v32 = vadd.f32 -3.0, %v2240_v28  ;;  %s2707_s16 = sshll.u32 %s1122_s23, 4  ;;  %s1159_s0 = sshll.u32 %s2262_s20, 4  ;;  %s1126_s16 = int_to_ptr.hbm [resolvable:$true] %s2707_s16  ;;  %s2723_s0 = int_to_ptr.vmem [resolvable:$true] %s1159_s0 }
  0x5a   : > { %541 = vst [vmem:[%s2123_s14] sm:$0xff] %v1492_v33  ;;  %v1523_v33 = vadd.f32 -3.0, %v2245_v30  ;;  %s2712_s15 = sshll.u32 %s1158_s13, 4  ;;  %s1676_s13 = sshra.s32 %s1126_s16, 4  ;;  %s1677_s13 = int_to_ptr.hbm [resolvable:$true] %s1676_s13 }
  0x5b   : > { %542 = vst [vmem:[%s2123_s14 + $0x8] sm:$0xff] %v1493_v34  ;;  %v637_v34 = vmul.f32 0.5, %v2011_v0  ;;  %2985 = sst [smem:[#allocation21_spill]] %s2712_s15  ;;  %s1678_s23 = scalar_lea.hbm %s1677_s13, 256 }
  0x5c   : > { %543 = vst [vmem:[%s2123_s14 + $0x10] sm:$0xff] %v1494_v35  ;;  %v638_v35 = vmul.f32 0.5, %v2014_v1  ;;  %p1679_p6 = scmp.ne.s32.totalorder %s1677_s13, %s1678_s23  ;;  %s1682_s15 = scalar_lea.hbm %s2949_s2, 512 }
  0x5d   : > { %544 = vst [vmem:[%s2123_s14 + $0x18] sm:$0xff] %v1495_v36  ;;  %v639_v36 = vmul.f32 0.5, %v2017_v2  ;;  %p1683_p1 = scmp.lt.s32.totalorder %s1677_s13, %s2949_s2  ;;  %p1684_p3 = scmp.lt.s32.totalorder %s1682_s15, %s1678_s23 }
  0x5e   : > { %545 = vst [vmem:[%s2123_s14 + $0x20] sm:$0xff] %v1496_v37  ;;  %v640_v37 = vmul.f32 0.5, %v2023_v3  ;;  %p1680_p13 = pnand %p1679_p6, %p1952_p11 }
  0x5f   : > { %546 = vst [vmem:[%s2123_s14 + $0x28] sm:$0xff] %v1497_v38  ;;  %v641_v38 = vmul.f32 0.5, %v2026_v4  ;;  %p1685_p4 = por %p1684_p3, %p1683_p1 }
  0x60   : > { %547 = vst [vmem:[%s2123_s14 + $0x30] sm:$0xff] %v1498_v40  ;;  %v642_v40 = vmul.f32 0.5, %v2029_v5  ;;  %p1681_p0 = pneg %p1680_p13 }
  0x61   : > { %548 = vst [vmem:[%s2123_s14 + $0x38] sm:$0xff] %v1499_v42  ;;  %v643_v42 = vmul.f32 0.5, %v2036_v10 }
  0x62   : > { %549 = vst [vmem:[%s2123_s14 + $0x40] sm:$0xff] %v1500_v44  ;;  %v644_v44 = vmul.f32 0.5, %v2039_v11  ;;  %p1686_p7 = pnand %p1685_p4, %p1681_p0 }
  0x63   : > { %550 = vst [vmem:[%s2123_s14 + $0x48] sm:$0xff] %v1501_v46  ;;  %v645_v46 = vmul.f32 0.5, %v2130_v39 }
  0x64   : > { %551 = vst [vmem:[%s2123_s14 + $0x50] sm:$0xff] %v1502_v48  ;;  %v646_v48 = vmul.f32 0.5, %v2135_v41 }
  0x65   : > { %552 = vst [vmem:[%s2123_s14 + $0x58] sm:$0xff] %v1503_v50  ;;  %v647_v50 = vmul.f32 0.5, %v2140_v43 }
  0x66   : > { %553 = vst [vmem:[%s2123_s14 + $0x60] sm:$0xff] %v1504_v52  ;;  %v648_v52 = vmul.f32 0.5, %v2145_v45 }
  0x67   : > { %554 = vst [vmem:[%s2123_s14 + $0x68] sm:$0xff] %v1505_v54  ;;  %v649_v54 = vmul.f32 0.5, %v2150_v47 }
  0x68   : > { %555 = vst [vmem:[%s2123_s14 + $0x70] sm:$0xff] %v1506_v56  ;;  %v650_v56 = vmul.f32 0.5, %v2155_v49 }
  0x69   : > { %556 = vst [vmem:[%s2123_s14 + $0x78] sm:$0xff] %v1507_v58  ;;  %v651_v58 = vmul.f32 0.5, %v2160_v51 }
  0x6a   : > { %557 = vst [vmem:[%s2123_s14 + $0x80] sm:$0xff] %v1508_v60  ;;  %v652_v60 = vmul.f32 0.5, %v2165_v53 }
  0x6b   : > { %558 = vst [vmem:[%s2123_s14 + $0x88] sm:$0xff] %v1509_v62  ;;  %v653_v62 = vmul.f32 0.5, %v2170_v55 }
  0x6c   : > { %559 = vst [vmem:[%s2123_s14 + $0x90] sm:$0xff] %v1510_v7  ;;  %v654_v7 = vmul.f32 0.5, %v2175_v57 }
  0x6d   : > { %560 = vst [vmem:[%s2123_s14 + $0x98] sm:$0xff] %v1511_v9  ;;  %v655_v9 = vmul.f32 0.5, %v2180_v59 }
  0x6e   : > { %561 = vst [vmem:[%s2123_s14 + $0xa0] sm:$0xff] %v1512_v13  ;;  %v656_v13 = vmul.f32 0.5, %v2185_v61 }
  0x6f   : > { %562 = vst [vmem:[%s2123_s14 + $0xa8] sm:$0xff] %v1513_v15  ;;  %v657_v15 = vmul.f32 0.5, %v2190_v63 }
  0x70   : > { %563 = vst [vmem:[%s2123_s14 + $0xb0] sm:$0xff] %v1514_v17  ;;  %v658_v17 = vmul.f32 0.5, %v2195_v8 }
  0x71   : > { %564 = vst [vmem:[%s2123_s14 + $0xb8] sm:$0xff] %v1515_v19  ;;  %v659_v19 = vmul.f32 0.5, %v2200_v12 }
  0x72   : > { %565 = vst [vmem:[%s2123_s14 + $0xc0] sm:$0xff] %v1516_v21  ;;  %v660_v21 = vmul.f32 0.5, %v2205_v14 }
  0x73   : > { %566 = vst [vmem:[%s2123_s14 + $0xc8] sm:$0xff] %v1517_v23  ;;  %v661_v23 = vmul.f32 0.5, %v2210_v16 }
  0x74   : > { %567 = vst [vmem:[%s2123_s14 + $0xd0] sm:$0xff] %v1518_v25  ;;  %v662_v25 = vmul.f32 0.5, %v2215_v18 }
  0x75   : > { %568 = vst [vmem:[%s2123_s14 + $0xd8] sm:$0xff] %v1519_v27  ;;  %v663_v27 = vmul.f32 0.5, %v2220_v20 }
  0x76   : > { %569 = vst [vmem:[%s2123_s14 + $0xe0] sm:$0xff] %v1520_v29  ;;  %v664_v29 = vmul.f32 0.5, %v2225_v22 }
  0x77   : > { %570 = vst [vmem:[%s2123_s14 + $0xe8] sm:$0xff] %v1521_v31  ;;  %v665_v31 = vmul.f32 0.5, %v2230_v24 }
  0x78   : > { %571 = vst [vmem:[%s2123_s14 + $0xf0] sm:$0xff] %v1522_v32  ;;  %v666_v32 = vmul.f32 0.5, %v2235_v26 }
  0x79   : > { %572 = vst [vmem:[%s2123_s14 + $0xf8] sm:$0xff] %v1523_v33  ;;  %v667_v33 = vmul.f32 0.5, %v2240_v28  ;;  %s2986_s14 = sand.u32 1, %s1921_s9  }
  0x7a   : > { %669 = vst [vmem:[%s2262_s20] sm:$0xff] %v637_v34  ;;  %v668_v34 = vmul.f32 0.5, %v2245_v30 }
  0x7b   : > { %670 = vst [vmem:[%s2262_s20 + $0x8] sm:$0xff] %v638_v35  ;;  %v805_v35 = vsel %vm773_vm8, 1, %v1852_v6  ;;  %vm965_vm8 = vcmp.eq.f32.partialorder %v2130_v39, 3.0 }
  0x7c   : > { %671 = vst [vmem:[%s2262_s20 + $0x10] sm:$0xff] %v639_v36  ;;  %v806_v36 = vsel %vm774_vm9, 1, %v1852_v6  ;;  %vm966_vm9 = vcmp.eq.f32.partialorder %v2135_v41, 3.0 }
  0x7d   : > { %672 = vst [vmem:[%s2262_s20 + $0x18] sm:$0xff] %v640_v37  ;;  %v807_v37 = vsel %vm775_vm10, 1, %v1852_v6  ;;  %vm967_vm10 = vcmp.eq.f32.partialorder %v2140_v43, 3.0 }
  0x7e   : > { %673 = vst [vmem:[%s2262_s20 + $0x20] sm:$0xff] %v641_v38  ;;  %v808_v38 = vsel %vm776_vm11, 1, %v1852_v6  ;;  %vm968_vm11 = vcmp.eq.f32.partialorder %v2145_v45, 3.0 }
  0x7f   : > { %674 = vst [vmem:[%s2262_s20 + $0x28] sm:$0xff] %v642_v40  ;;  %v809_v40 = vsel %vm777_vm12, 1, %v1852_v6  ;;  %vm969_vm12 = vcmp.eq.f32.partialorder %v2150_v47, 3.0 }
  0x80   : > { %675 = vst [vmem:[%s2262_s20 + $0x30] sm:$0xff] %v643_v42  ;;  %v810_v42 = vsel %vm778_vm13, 1, %v1852_v6  ;;  %vm970_vm13 = vcmp.eq.f32.partialorder %v2155_v49, 3.0 }
  0x81   : > { %676 = vst [vmem:[%s2262_s20 + $0x38] sm:$0xff] %v644_v44  ;;  %v811_v44 = vsel %vm779_vm14, 1, %v1852_v6  ;;  %vm971_vm14 = vcmp.eq.f32.partialorder %v2160_v51, 3.0 }
  0x82   : > { %677 = vst [vmem:[%s2262_s20 + $0x40] sm:$0xff] %v645_v46  ;;  %v812_v46 = vsel %vm780_vm15, 1, %v1852_v6  ;;  %vm972_vm15 = vcmp.eq.f32.partialorder %v2165_v53, 3.0 }
  0x83   : > { %678 = vst [vmem:[%s2262_s20 + $0x48] sm:$0xff] %v646_v48  ;;  %v901_v48 = vsel %vm869_vm0, 1, %v1852_v6  ;;  %vm781_vm0 = vcmp.gt.f32.partialorder %v2170_v55, 1.0 }
  0x84   : > { %679 = vst [vmem:[%s2262_s20 + $0x50] sm:$0xff] %v647_v50  ;;  %v902_v50 = vsel %vm870_vm1, 1, %v1852_v6  ;;  %vm782_vm1 = vcmp.gt.f32.partialorder %v2175_v57, 1.0 }
  0x85   : > { %680 = vst [vmem:[%s2262_s20 + $0x58] sm:$0xff] %v648_v52  ;;  %v903_v52 = vsel %vm871_vm2, 1, %v1852_v6  ;;  %vm783_vm2 = vcmp.gt.f32.partialorder %v2180_v59, 1.0 }
  0x86   : > { %681 = vst [vmem:[%s2262_s20 + $0x60] sm:$0xff] %v649_v54  ;;  %v904_v54 = vsel %vm872_vm3, 1, %v1852_v6  ;;  %vm784_vm3 = vcmp.gt.f32.partialorder %v2185_v61, 1.0 }
  0x87   : > { %682 = vst [vmem:[%s2262_s20 + $0x68] sm:$0xff] %v650_v56  ;;  %v905_v56 = vsel %vm873_vm4, 1, %v1852_v6  ;;  %vm785_vm4 = vcmp.gt.f32.partialorder %v2190_v63, 1.0 }
  0x88   : > { %683 = vst [vmem:[%s2262_s20 + $0x70] sm:$0xff] %v651_v58  ;;  %v906_v58 = vsel %vm874_vm5, 1, %v1852_v6  ;;  %vm786_vm5 = vcmp.gt.f32.partialorder %v2195_v8, 1.0 }
  0x89   : > { %684 = vst [vmem:[%s2262_s20 + $0x78] sm:$0xff] %v652_v60  ;;  %v907_v60 = vsel %vm875_vm6, 1, %v1852_v6  ;;  %vm787_vm6 = vcmp.gt.f32.partialorder %v2200_v12, 1.0 }
  0x8a   : > { %685 = vst [vmem:[%s2262_s20 + $0x80] sm:$0xff] %v653_v62  ;;  %v908_v62 = vsel %vm876_vm7, 1, %v1852_v6  ;;  %vm788_vm7 = vcmp.gt.f32.partialorder %v2205_v14, 1.0 }
  0x8b   : > { %686 = vst [vmem:[%s2262_s20 + $0x88] sm:$0xff] %v654_v7  ;;  %v997_v7 = vsel %vm965_vm8, 1, %v1852_v6  ;;  %vm877_vm8 = vcmp.lt.f32.partialorder %v2170_v55, 5.0 }
  0x8c   : > { %687 = vst [vmem:[%s2262_s20 + $0x90] sm:$0xff] %v655_v9  ;;  %v998_v9 = vsel %vm966_vm9, 1, %v1852_v6  ;;  %vm878_vm9 = vcmp.lt.f32.partialorder %v2175_v57, 5.0 }
  0x8d   : > { %688 = vst [vmem:[%s2262_s20 + $0x98] sm:$0xff] %v656_v13  ;;  %v999_v13 = vsel %vm967_vm10, 1, %v1852_v6  ;;  %vm879_vm10 = vcmp.lt.f32.partialorder %v2180_v59, 5.0 }
  0x8e   : > { %689 = vst [vmem:[%s2262_s20 + $0xa0] sm:$0xff] %v657_v15  ;;  %v1000_v15 = vsel %vm968_vm11, 1, %v1852_v6  ;;  %vm880_vm11 = vcmp.lt.f32.partialorder %v2185_v61, 5.0 }
  0x8f   : > { %690 = vst [vmem:[%s2262_s20 + $0xa8] sm:$0xff] %v658_v17  ;;  %v1001_v17 = vsel %vm969_vm12, 1, %v1852_v6  ;;  %vm881_vm12 = vcmp.lt.f32.partialorder %v2190_v63, 5.0 }
  0x90   : > { %691 = vst [vmem:[%s2262_s20 + $0xb0] sm:$0xff] %v659_v19  ;;  %v1002_v19 = vsel %vm970_vm13, 1, %v1852_v6  ;;  %vm882_vm13 = vcmp.lt.f32.partialorder %v2195_v8, 5.0 }
  0x91   : > { %692 = vst [vmem:[%s2262_s20 + $0xb8] sm:$0xff] %v660_v21  ;;  %v1003_v21 = vsel %vm971_vm14, 1, %v1852_v6  ;;  %vm883_vm14 = vcmp.lt.f32.partialorder %v2200_v12, 5.0 }
  0x92   : > { %693 = vst [vmem:[%s2262_s20 + $0xc0] sm:$0xff] %v661_v23  ;;  %v1004_v23 = vsel %vm972_vm15, 1, %v1852_v6  ;;  %vm884_vm15 = vcmp.lt.f32.partialorder %v2205_v14, 5.0 }
  0x93   : > { %694 = vst [vmem:[%s2262_s20 + $0xc8] sm:$0xff] %v662_v25  ;;  %v445_v25 = vadd.f32 2.0, %v2011_v0 }
  0x94   : > { %695 = vst [vmem:[%s2262_s20 + $0xd0] sm:$0xff] %v663_v27  ;;  %v446_v27 = vadd.f32 2.0, %v2014_v1 }
  0x95   : > { %696 = vst [vmem:[%s2262_s20 + $0xd8] sm:$0xff] %v664_v29  ;;  %v447_v29 = vadd.f32 2.0, %v2017_v2 }
  0x96   : > { %697 = vst [vmem:[%s2262_s20 + $0xe0] sm:$0xff] %v665_v31  ;;  %v448_v31 = vadd.f32 2.0, %v2023_v3 }
  0x97   : > { %698 = vst [vmem:[%s2262_s20 + $0xe8] sm:$0xff] %v666_v32  ;;  %v449_v32 = vadd.f32 2.0, %v2026_v4 }
  0x98   : > { %699 = vst [vmem:[%s2262_s20 + $0xf0] sm:$0xff] %v667_v33  ;;  %v450_v33 = vadd.f32 2.0, %v2029_v5 }
  0x99   : > { %700 = vst [vmem:[%s2262_s20 + $0xf8] sm:$0xff] %v668_v34  ;;  %v451_v34 = vadd.f32 2.0, %v2036_v10  ;;  %s2732_s20 = scalar_lea.sflag [#allocation7], %s2986_s14 }
  0x9a   : > { %837 = vst [vmem:[%s2008_s21 + $0x40] sm:$0xff] %v805_v35  ;;  %v452_v35 = vadd.f32 2.0, %v2039_v11 }
  0x9b   : > { %838 = vst [vmem:[%s2008_s21 + $0x48] sm:$0xff] %v806_v36  ;;  %v453_v36 = vadd.f32 2.0, %v2130_v39 }
  0x9c   : > { %839 = vst [vmem:[%s2008_s21 + $0x50] sm:$0xff] %v807_v37  ;;  %v454_v37 = vadd.f32 2.0, %v2135_v41 }
  0x9d   : > { %840 = vst [vmem:[%s2008_s21 + $0x58] sm:$0xff] %v808_v38  ;;  %v455_v38 = vadd.f32 2.0, %v2140_v43 }
  0x9e   : > { %841 = vst [vmem:[%s2008_s21 + $0x60] sm:$0xff] %v809_v40  ;;  %v456_v40 = vadd.f32 2.0, %v2145_v45 }
  0x9f   : > { %842 = vst [vmem:[%s2008_s21 + $0x68] sm:$0xff] %v810_v42  ;;  %v457_v42 = vadd.f32 2.0, %v2150_v47 }
  0xa0   : > { %843 = vst [vmem:[%s2008_s21 + $0x70] sm:$0xff] %v811_v44  ;;  %v458_v44 = vadd.f32 2.0, %v2155_v49 }
  0xa1   : > { %844 = vst [vmem:[%s2008_s21 + $0x78] sm:$0xff] %v812_v46  ;;  %v459_v46 = vadd.f32 2.0, %v2160_v51 }
  0xa2   : > { %933 = vst [vmem:[%s2063_s22 + $0x40] sm:$0xff] %v901_v48  ;;  %v460_v48 = vadd.f32 2.0, %v2165_v53 }
  0xa3   : > { %934 = vst [vmem:[%s2063_s22 + $0x48] sm:$0xff] %v902_v50  ;;  %v461_v50 = vadd.f32 2.0, %v2170_v55 }
  0xa4   : > { %935 = vst [vmem:[%s2063_s22 + $0x50] sm:$0xff] %v903_v52  ;;  %v462_v52 = vadd.f32 2.0, %v2175_v57 }
  0xa5   : > { %936 = vst [vmem:[%s2063_s22 + $0x58] sm:$0xff] %v904_v54  ;;  %v463_v54 = vadd.f32 2.0, %v2180_v59 }
  0xa6   : > { %937 = vst [vmem:[%s2063_s22 + $0x60] sm:$0xff] %v905_v56  ;;  %v464_v56 = vadd.f32 2.0, %v2185_v61 }
  0xa7   : > { %938 = vst [vmem:[%s2063_s22 + $0x68] sm:$0xff] %v906_v58  ;;  %v465_v58 = vadd.f32 2.0, %v2190_v63 }
  0xa8   : > { %939 = vst [vmem:[%s2063_s22 + $0x70] sm:$0xff] %v907_v60  ;;  %v466_v60 = vadd.f32 2.0, %v2195_v8 }
  0xa9   : > { %940 = vst [vmem:[%s2063_s22 + $0x78] sm:$0xff] %v908_v62  ;;  %v467_v62 = vadd.f32 2.0, %v2200_v12 }
  0xaa   : > { %1029 = vst [vmem:[%s2093_s24 + $0x40] sm:$0xff] %v997_v7  ;;  %v468_v7 = vadd.f32 2.0, %v2205_v14 }
  0xab   : > { %1030 = vst [vmem:[%s2093_s24 + $0x48] sm:$0xff] %v998_v9  ;;  %v469_v9 = vadd.f32 2.0, %v2210_v16 }
  0xac   : > { %1031 = vst [vmem:[%s2093_s24 + $0x50] sm:$0xff] %v999_v13  ;;  %v470_v13 = vadd.f32 2.0, %v2215_v18 }
  0xad   : > { %1032 = vst [vmem:[%s2093_s24 + $0x58] sm:$0xff] %v1000_v15  ;;  %v471_v15 = vadd.f32 2.0, %v2220_v20 }
  0xae   : > { %1033 = vst [vmem:[%s2093_s24 + $0x60] sm:$0xff] %v1001_v17  ;;  %v472_v17 = vadd.f32 2.0, %v2225_v22 }
  0xaf   : > { %1034 = vst [vmem:[%s2093_s24 + $0x68] sm:$0xff] %v1002_v19  ;;  %v473_v19 = vadd.f32 2.0, %v2230_v24 }
  0xb0   : > { %1035 = vst [vmem:[%s2093_s24 + $0x70] sm:$0xff] %v1003_v21  ;;  %v474_v21 = vadd.f32 2.0, %v2235_v26 }
  0xb1   : > { %1036 = vst [vmem:[%s2093_s24 + $0x78] sm:$0xff] %v1004_v23  ;;  %v475_v23 = vadd.f32 2.0, %v2240_v28 }
  0xb2   : > { %477 = vst [vmem:[%s2401_s10] sm:$0xff] %v445_v25  ;;  %v476_v25 = vadd.f32 2.0, %v2245_v30 }
  0xb3   : > { %478 = vst [vmem:[%s2401_s10 + $0x8] sm:$0xff] %v446_v27  ;;  %v573_v27 = vmul.f32 4.0, %v2011_v0 }
  0xb4   : > { %479 = vst [vmem:[%s2401_s10 + $0x10] sm:$0xff] %v447_v29  ;;  %v574_v29 = vmul.f32 4.0, %v2014_v1 }
  0xb5   : > { %480 = vst [vmem:[%s2401_s10 + $0x18] sm:$0xff] %v448_v31  ;;  %v575_v31 = vmul.f32 4.0, %v2017_v2 }
  0xb6   : > { %481 = vst [vmem:[%s2401_s10 + $0x20] sm:$0xff] %v449_v32  ;;  %v576_v32 = vmul.f32 4.0, %v2023_v3 }
  0xb7   : > { %482 = vst [vmem:[%s2401_s10 + $0x28] sm:$0xff] %v450_v33  ;;  %v577_v33 = vmul.f32 4.0, %v2026_v4 }
  0xb8   : > { %483 = vst [vmem:[%s2401_s10 + $0x30] sm:$0xff] %v451_v34  ;;  %v578_v34 = vmul.f32 4.0, %v2029_v5 }
  0xb9   : > { %484 = vst [vmem:[%s2401_s10 + $0x38] sm:$0xff] %v452_v35  ;;  %v579_v35 = vmul.f32 4.0, %v2036_v10 }
  0xba   : > { %485 = vst [vmem:[%s2401_s10 + $0x40] sm:$0xff] %v453_v36  ;;  %v580_v36 = vmul.f32 4.0, %v2039_v11 }
  0xbb   : > { %486 = vst [vmem:[%s2401_s10 + $0x48] sm:$0xff] %v454_v37  ;;  %v581_v37 = vmul.f32 4.0, %v2130_v39 }
  0xbc   : > { %487 = vst [vmem:[%s2401_s10 + $0x50] sm:$0xff] %v455_v38  ;;  %v582_v38 = vmul.f32 4.0, %v2135_v41 }
  0xbd   : > { %488 = vst [vmem:[%s2401_s10 + $0x58] sm:$0xff] %v456_v40  ;;  %v583_v40 = vmul.f32 4.0, %v2140_v43 }
  0xbe   : > { %489 = vst [vmem:[%s2401_s10 + $0x60] sm:$0xff] %v457_v42  ;;  %v584_v42 = vmul.f32 4.0, %v2145_v45 }
  0xbf   : > { %490 = vst [vmem:[%s2401_s10 + $0x68] sm:$0xff] %v458_v44  ;;  %v585_v44 = vmul.f32 4.0, %v2150_v47 }
  0xc0   : > { %491 = vst [vmem:[%s2401_s10 + $0x70] sm:$0xff] %v459_v46  ;;  %v586_v46 = vmul.f32 4.0, %v2155_v49 }
  0xc1   : > { %492 = vst [vmem:[%s2401_s10 + $0x78] sm:$0xff] %v460_v48  ;;  %v587_v48 = vmul.f32 4.0, %v2160_v51 }
  0xc2   : > { %493 = vst [vmem:[%s2401_s10 + $0x80] sm:$0xff] %v461_v50  ;;  %v588_v50 = vmul.f32 4.0, %v2165_v53 }
  0xc3   : > { %494 = vst [vmem:[%s2401_s10 + $0x88] sm:$0xff] %v462_v52  ;;  %v589_v52 = vmul.f32 4.0, %v2170_v55 }
  0xc4   : > { %495 = vst [vmem:[%s2401_s10 + $0x90] sm:$0xff] %v463_v54  ;;  %v590_v54 = vmul.f32 4.0, %v2175_v57 }
  0xc5   : > { %496 = vst [vmem:[%s2401_s10 + $0x98] sm:$0xff] %v464_v56  ;;  %v591_v56 = vmul.f32 4.0, %v2180_v59 }
  0xc6   : > { %497 = vst [vmem:[%s2401_s10 + $0xa0] sm:$0xff] %v465_v58  ;;  %v592_v58 = vmul.f32 4.0, %v2185_v61 }
  0xc7   : > { %498 = vst [vmem:[%s2401_s10 + $0xa8] sm:$0xff] %v466_v60  ;;  %v593_v60 = vmul.f32 4.0, %v2190_v63 }
  0xc8   : > { %499 = vst [vmem:[%s2401_s10 + $0xb0] sm:$0xff] %v467_v62  ;;  %v594_v62 = vmul.f32 4.0, %v2195_v8 }
  0xc9   : > { %500 = vst [vmem:[%s2401_s10 + $0xb8] sm:$0xff] %v468_v7  ;;  %v595_v7 = vmul.f32 4.0, %v2200_v12 }
  0xca   : > { %501 = vst [vmem:[%s2401_s10 + $0xc0] sm:$0xff] %v469_v9  ;;  %v596_v9 = vmul.f32 4.0, %v2205_v14 }
  0xcb   : > { %502 = vst [vmem:[%s2401_s10 + $0xc8] sm:$0xff] %v470_v13  ;;  %v597_v13 = vmul.f32 4.0, %v2210_v16 }
  0xcc   : > { %503 = vst [vmem:[%s2401_s10 + $0xd0] sm:$0xff] %v471_v15  ;;  %v598_v15 = vmul.f32 4.0, %v2215_v18 }
  0xcd   : > { %504 = vst [vmem:[%s2401_s10 + $0xd8] sm:$0xff] %v472_v17  ;;  %v599_v17 = vmul.f32 4.0, %v2220_v20 }
  0xce   : > { %505 = vst [vmem:[%s2401_s10 + $0xe0] sm:$0xff] %v473_v19  ;;  %v600_v19 = vmul.f32 4.0, %v2225_v22 }
  0xcf   : > { %506 = vst [vmem:[%s2401_s10 + $0xe8] sm:$0xff] %v474_v21  ;;  %v601_v21 = vmul.f32 4.0, %v2230_v24 }
  0xd0   : > { %507 = vst [vmem:[%s2401_s10 + $0xf0] sm:$0xff] %v475_v23  ;;  %v602_v23 = vmul.f32 4.0, %v2235_v26 }
  0xd1   : > { %508 = vst [vmem:[%s2401_s10 + $0xf8] sm:$0xff] %v476_v25  ;;  %v603_v25 = vmul.f32 4.0, %v2240_v28 }
  0xd2   : > { %605 = vst [vmem:[%s2468_s25] sm:$0xff] %v573_v27  ;;  %v604_v27 = vmul.f32 4.0, %v2245_v30 }
  0xd3   : > { %606 = vst [vmem:[%s2468_s25 + $0x8] sm:$0xff] %v574_v29  ;;  %v701_v29 = vmul.f32 %v2011_v0, %v2011_v0  ;;  %v705_v0 = vmul.f32 %v2026_v4, %v2026_v4  ;;  %v709_v4 = vmul.f32 %v2130_v39, %v2130_v39  ;;  %v713_v39 = vmul.f32 %v2150_v47, %v2150_v47 }
  0xd4   : > { %607 = vst [vmem:[%s2468_s25 + $0x10] sm:$0xff] %v575_v31  ;;  %v702_v31 = vmul.f32 %v2014_v1, %v2014_v1  ;;  %v706_v1 = vmul.f32 %v2029_v5, %v2029_v5  ;;  %v710_v5 = vmul.f32 %v2135_v41, %v2135_v41  ;;  %v714_v41 = vmul.f32 %v2155_v49, %v2155_v49 }
  0xd5   : > { %608 = vst [vmem:[%s2468_s25 + $0x18] sm:$0xff] %v576_v32  ;;  %v703_v32 = vmul.f32 %v2017_v2, %v2017_v2  ;;  %v707_v2 = vmul.f32 %v2036_v10, %v2036_v10  ;;  %v711_v10 = vmul.f32 %v2140_v43, %v2140_v43  ;;  %v715_v43 = vmul.f32 %v2160_v51, %v2160_v51 }
  0xd6   : > { %609 = vst [vmem:[%s2468_s25 + $0x20] sm:$0xff] %v577_v33  ;;  %v704_v33 = vmul.f32 %v2023_v3, %v2023_v3  ;;  %v708_v3 = vmul.f32 %v2039_v11, %v2039_v11  ;;  %v712_v11 = vmul.f32 %v2145_v45, %v2145_v45  ;;  %v716_v45 = vmul.f32 %v2165_v53, %v2165_v53 }
  0xd7   : > { %610 = vst [vmem:[%s2468_s25 + $0x28] sm:$0xff] %v578_v34  ;;  %v717_v47 = vmul.f32 %v2170_v55, %v2170_v55  ;;  %v718_v49 = vmul.f32 %v2175_v57, %v2175_v57  ;;  %v719_v51 = vmul.f32 %v2180_v59, %v2180_v59  ;;  %v720_v53 = vmul.f32 %v2185_v61, %v2185_v61 }
  0xd8   : > { %611 = vst [vmem:[%s2468_s25 + $0x30] sm:$0xff] %v579_v35  ;;  %v721_v34 = vmul.f32 %v2190_v63, %v2190_v63  ;;  %v722_v35 = vmul.f32 %v2195_v8, %v2195_v8 }
  0xd9   : > { %612 = vst [vmem:[%s2468_s25 + $0x38] sm:$0xff] %v580_v36  ;;  %v723_v36 = vmul.f32 %v2200_v12, %v2200_v12 }
  0xda   : > { %613 = vst [vmem:[%s2468_s25 + $0x40] sm:$0xff] %v581_v37  ;;  %v724_v37 = vmul.f32 %v2205_v14, %v2205_v14 }
  0xdb   : > { %614 = vst [vmem:[%s2468_s25 + $0x48] sm:$0xff] %v582_v38  ;;  %v725_v38 = vmul.f32 %v2210_v16, %v2210_v16 }
  0xdc   : > { %615 = vst [vmem:[%s2468_s25 + $0x50] sm:$0xff] %v583_v40  ;;  %v726_v40 = vmul.f32 %v2215_v18, %v2215_v18 }
  0xdd   : > { %616 = vst [vmem:[%s2468_s25 + $0x58] sm:$0xff] %v584_v42  ;;  %v727_v42 = vmul.f32 %v2220_v20, %v2220_v20 }
  0xde   : > { %617 = vst [vmem:[%s2468_s25 + $0x60] sm:$0xff] %v585_v44  ;;  %v728_v44 = vmul.f32 %v2225_v22, %v2225_v22 }
  0xdf   : > { %618 = vst [vmem:[%s2468_s25 + $0x68] sm:$0xff] %v586_v46  ;;  %v729_v46 = vmul.f32 %v2230_v24, %v2230_v24 }
  0xe0   : > { %619 = vst [vmem:[%s2468_s25 + $0x70] sm:$0xff] %v587_v48  ;;  %v730_v48 = vmul.f32 %v2235_v26, %v2235_v26 }
  0xe1   : > { %620 = vst [vmem:[%s2468_s25 + $0x78] sm:$0xff] %v588_v50  ;;  %v731_v50 = vmul.f32 %v2240_v28, %v2240_v28 }
  0xe2   : > { %621 = vst [vmem:[%s2468_s25 + $0x80] sm:$0xff] %v589_v52  ;;  %v732_v52 = vmul.f32 %v2245_v30, %v2245_v30 }
  0xe3   : > { %622 = vst [vmem:[%s2468_s25 + $0x88] sm:$0xff] %v590_v54  ;;  %v813_v54 = vsel %vm781_vm0, 1, %v1852_v6  ;;  %vm973_vm0 = vcmp.eq.f32.partialorder %v2170_v55, 3.0 }
  0xe4   : > { %623 = vst [vmem:[%s2468_s25 + $0x90] sm:$0xff] %v591_v56  ;;  %v814_v56 = vsel %vm782_vm1, 1, %v1852_v6  ;;  %vm974_vm1 = vcmp.eq.f32.partialorder %v2175_v57, 3.0 }
  0xe5   : > { %624 = vst [vmem:[%s2468_s25 + $0x98] sm:$0xff] %v592_v58  ;;  %v815_v58 = vsel %vm783_vm2, 1, %v1852_v6  ;;  %vm975_vm2 = vcmp.eq.f32.partialorder %v2180_v59, 3.0  ;;  %v1006_v55 = vsel %vm974_vm1, 1, %v1852_v6 }
  0xe6   : > { %625 = vst [vmem:[%s2468_s25 + $0xa0] sm:$0xff] %v593_v60  ;;  %v816_v60 = vsel %vm784_vm3, 1, %v1852_v6  ;;  %vm976_vm3 = vcmp.eq.f32.partialorder %v2185_v61, 3.0  ;;  %v1007_v57 = vsel %vm975_vm2, 1, %v1852_v6 }
  0xe7   : > { %626 = vst [vmem:[%s2468_s25 + $0xa8] sm:$0xff] %v594_v62  ;;  %v817_v62 = vsel %vm785_vm4, 1, %v1852_v6  ;;  %vm977_vm4 = vcmp.eq.f32.partialorder %v2190_v63, 3.0  ;;  %v1008_v59 = vsel %vm976_vm3, 1, %v1852_v6 }
  0xe8   : > { %627 = vst [vmem:[%s2468_s25 + $0xb0] sm:$0xff] %v595_v7  ;;  %v818_v7 = vsel %vm786_vm5, 1, %v1852_v6  ;;  %vm978_vm5 = vcmp.eq.f32.partialorder %v2195_v8, 3.0  ;;  %v1009_v61 = vsel %vm977_vm4, 1, %v1852_v6 }
  0xe9   : > { %628 = vst [vmem:[%s2468_s25 + $0xb8] sm:$0xff] %v596_v9  ;;  %v819_v9 = vsel %vm787_vm6, 1, %v1852_v6  ;;  %vm979_vm6 = vcmp.eq.f32.partialorder %v2200_v12, 3.0  ;;  %v1010_v63 = vsel %vm978_vm5, 1, %v1852_v6 }
  0xea   : > { %629 = vst [vmem:[%s2468_s25 + $0xc0] sm:$0xff] %v597_v13  ;;  %v820_v13 = vsel %vm788_vm7, 1, %v1852_v6  ;;  %vm980_vm7 = vcmp.eq.f32.partialorder %v2205_v14, 3.0  ;;  %v1011_v8 = vsel %vm979_vm6, 1, %v1852_v6 }
  0xeb   : > { %630 = vst [vmem:[%s2468_s25 + $0xc8] sm:$0xff] %v598_v15  ;;  %v909_v15 = vsel %vm877_vm8, 1, %v1852_v6  ;;  %v1012_v12 = vsel %vm980_vm7, 1, %v1852_v6  ;;  %vm789_vm8 = vcmp.gt.f32.partialorder %v2210_v16, 1.0 }
  0xec   : > { %631 = vst [vmem:[%s2468_s25 + $0xd0] sm:$0xff] %v599_v17  ;;  %v910_v17 = vsel %vm878_vm9, 1, %v1852_v6  ;;  %vm790_vm9 = vcmp.gt.f32.partialorder %v2215_v18, 1.0  ;;  %v821_v14 = vsel %vm789_vm8, 1, %v1852_v6 }
  0xed   : > { %632 = vst [vmem:[%s2468_s25 + $0xd8] sm:$0xff] %v600_v19  ;;  %v911_v19 = vsel %vm879_vm10, 1, %v1852_v6  ;;  %vm791_vm10 = vcmp.gt.f32.partialorder %v2220_v20, 1.0 }
  0xee   : > { %633 = vst [vmem:[%s2468_s25 + $0xe0] sm:$0xff] %v601_v21  ;;  %v912_v21 = vsel %vm880_vm11, 1, %v1852_v6  ;;  %vm792_vm11 = vcmp.gt.f32.partialorder %v2225_v22, 1.0 }
  0xef   : > { %634 = vst [vmem:[%s2468_s25 + $0xe8] sm:$0xff] %v602_v23  ;;  %v913_v23 = vsel %vm881_vm12, 1, %v1852_v6 }
  0xf0   : > { %635 = vst [vmem:[%s2468_s25 + $0xf0] sm:$0xff] %v603_v25  ;;  %v914_v25 = vsel %vm882_vm13, 1, %v1852_v6 }
  0xf1   : > { %636 = vst [vmem:[%s2468_s25 + $0xf8] sm:$0xff] %v604_v27  ;;  %v915_v27 = vsel %vm883_vm14, 1, %v1852_v6 }
  0xf2   : > { %733 = vst [vmem:[%s2539_s12] sm:$0xff] %v701_v29  ;;  %v916_v29 = vsel %vm884_vm15, 1, %v1852_v6 }
  0xf3   : > { %734 = vst [vmem:[%s2539_s12 + $0x8] sm:$0xff] %v702_v31  ;;  %v1005_v31 = vsel %vm973_vm0, 1, %v1852_v6 }
  0xf4   : > { %735 = vst [vmem:[%s2539_s12 + $0x10] sm:$0xff] %v703_v32 }
  0xf5   : > { %736 = vst [vmem:[%s2539_s12 + $0x18] sm:$0xff] %v704_v33 }
  0xf6   : > { %737 = vst [vmem:[%s2539_s12 + $0x20] sm:$0xff] %v705_v0 }
  0xf7   : > { %738 = vst [vmem:[%s2539_s12 + $0x28] sm:$0xff] %v706_v1 }
  0xf8   : > { %739 = vst [vmem:[%s2539_s12 + $0x30] sm:$0xff] %v707_v2 }
  0xf9   : > { %740 = vst [vmem:[%s2539_s12 + $0x38] sm:$0xff] %v708_v3 }
  0xfa   : > { %741 = vst [vmem:[%s2539_s12 + $0x40] sm:$0xff] %v709_v4 }
  0xfb   : > { %742 = vst [vmem:[%s2539_s12 + $0x48] sm:$0xff] %v710_v5 }
  0xfc   : > { %743 = vst [vmem:[%s2539_s12 + $0x50] sm:$0xff] %v711_v10 }
  0xfd   : > { %744 = vst [vmem:[%s2539_s12 + $0x58] sm:$0xff] %v712_v11 }
  0xfe   : > { %745 = vst [vmem:[%s2539_s12 + $0x60] sm:$0xff] %v713_v39 }
  0xff   : > { %746 = vst [vmem:[%s2539_s12 + $0x68] sm:$0xff] %v714_v41 }
 0x100   : > { %747 = vst [vmem:[%s2539_s12 + $0x70] sm:$0xff] %v715_v43 }
 0x101   : > { %748 = vst [vmem:[%s2539_s12 + $0x78] sm:$0xff] %v716_v45 }
 0x102   : > { %749 = vst [vmem:[%s2539_s12 + $0x80] sm:$0xff] %v717_v47 }
 0x103   : > { %750 = vst [vmem:[%s2539_s12 + $0x88] sm:$0xff] %v718_v49 }
 0x104   : > { %751 = vst [vmem:[%s2539_s12 + $0x90] sm:$0xff] %v719_v51 }
 0x105   : > { %752 = vst [vmem:[%s2539_s12 + $0x98] sm:$0xff] %v720_v53 }
 0x106   : > { %753 = vst [vmem:[%s2539_s12 + $0xa0] sm:$0xff] %v721_v34 }
 0x107   : > { %754 = vst [vmem:[%s2539_s12 + $0xa8] sm:$0xff] %v722_v35 }
 0x108   : > { %755 = vst [vmem:[%s2539_s12 + $0xb0] sm:$0xff] %v723_v36 }
 0x109   : > { %756 = vst [vmem:[%s2539_s12 + $0xb8] sm:$0xff] %v724_v37 }
 0x10a   : > { %757 = vst [vmem:[%s2539_s12 + $0xc0] sm:$0xff] %v725_v38 }
 0x10b   : > { %758 = vst [vmem:[%s2539_s12 + $0xc8] sm:$0xff] %v726_v40 }
 0x10c   : > { %759 = vst [vmem:[%s2539_s12 + $0xd0] sm:$0xff] %v727_v42 }
 0x10d   : > { %760 = vst [vmem:[%s2539_s12 + $0xd8] sm:$0xff] %v728_v44 }
 0x10e   : > { %761 = vst [vmem:[%s2539_s12 + $0xe0] sm:$0xff] %v729_v46 }
 0x10f   : > { %762 = vst [vmem:[%s2539_s12 + $0xe8] sm:$0xff] %v730_v48 }
 0x110   : > { %763 = vst [vmem:[%s2539_s12 + $0xf0] sm:$0xff] %v731_v50 }
 0x111   : > { %764 = vst [vmem:[%s2539_s12 + $0xf8] sm:$0xff] %v732_v52 }
 0x112   : > { %845 = vst [vmem:[%s2008_s21 + $0x80] sm:$0xff] %v813_v54 }
 0x113   : > { %846 = vst [vmem:[%s2008_s21 + $0x88] sm:$0xff] %v814_v56 }
 0x114   : > { %847 = vst [vmem:[%s2008_s21 + $0x90] sm:$0xff] %v815_v58 }
 0x115   : > { %848 = vst [vmem:[%s2008_s21 + $0x98] sm:$0xff] %v816_v60 }
 0x116   : > { %849 = vst [vmem:[%s2008_s21 + $0xa0] sm:$0xff] %v817_v62 }
 0x117   : > { %850 = vst [vmem:[%s2008_s21 + $0xa8] sm:$0xff] %v818_v7 }
 0x118   : > { %851 = vst [vmem:[%s2008_s21 + $0xb0] sm:$0xff] %v819_v9 }
 0x119   : > { %852 = vst [vmem:[%s2008_s21 + $0xb8] sm:$0xff] %v820_v13 }
 0x11a   : > { %941 = vst [vmem:[%s2063_s22 + $0x80] sm:$0xff] %v909_v15 }
 0x11b   : > { %942 = vst [vmem:[%s2063_s22 + $0x88] sm:$0xff] %v910_v17 }
 0x11c   : > { %943 = vst [vmem:[%s2063_s22 + $0x90] sm:$0xff] %v911_v19 }
 0x11d   : > { %944 = vst [vmem:[%s2063_s22 + $0x98] sm:$0xff] %v912_v21 }
 0x11e   : > { %945 = vst [vmem:[%s2063_s22 + $0xa0] sm:$0xff] %v913_v23 }
 0x11f   : > { %946 = vst [vmem:[%s2063_s22 + $0xa8] sm:$0xff] %v914_v25 }
 0x120   : > { %947 = vst [vmem:[%s2063_s22 + $0xb0] sm:$0xff] %v915_v27 }
 0x121   : > { %948 = vst [vmem:[%s2063_s22 + $0xb8] sm:$0xff] %v916_v29 }
 0x122   : > { %1037 = vst [vmem:[%s2093_s24 + $0x80] sm:$0xff] %v1005_v31 }
 0x123   : > { %1038 = vst [vmem:[%s2093_s24 + $0x88] sm:$0xff] %v1006_v55 }
 0x124   : > { %1039 = vst [vmem:[%s2093_s24 + $0x90] sm:$0xff] %v1007_v57 }
 0x125   : > { %1040 = vst [vmem:[%s2093_s24 + $0x98] sm:$0xff] %v1008_v59 }
 0x126   : > { %1041 = vst [vmem:[%s2093_s24 + $0xa0] sm:$0xff] %v1009_v61 }
 0x127   : > { %1042 = vst [vmem:[%s2093_s24 + $0xa8] sm:$0xff] %v1010_v63 }
 0x128   : > { %1043 = vst [vmem:[%s2093_s24 + $0xb0] sm:$0xff] %v1011_v8 }
 0x129   : > { %1044 = vst [vmem:[%s2093_s24 + $0xb8] sm:$0xff] %v1012_v12 }
 0x12a   : > { %1689 = shalt.err (!%p1686_p7)
}
 0x12b   : > { %s2965_s14 = smov 1024   ;;  %s2987_s11 = sld [smem:[#allocation21_spill]]  ;;  %v822_v32 = vsel %vm790_vm9, 1, %v1852_v6  ;;  %vm793_vm12 = vcmp.gt.f32.partialorder %v2230_v24, 1.0 }
 0x12c   : > { %s1854_s30 = smov 64   ;;  %s2988_s7 = sand.u32 1, %s1921_s9  }
 0x12d   : > { %1564 = dma.vmem_to_hbm [thread:$0]  (%p1952_p11), %s2716_s6, 4096, %s1126_s16, %s2732_s20, %s2965_s14, %s2965_s14, %s1854_s30  }
 0x12e   : > { %s2755_s8 = scalar_lea.sflag [#allocation10], %s2988_s7  ;;  %s1710_s6 = scalar_lea.hbm %s2951_s4, 512 }
 0x131   : > { %s2989_s28 = int_to_ptr.hbm [resolvable:$true] %s2987_s11 }
 0x132   : > { %s1704_s15 = sshra.s32 %s2989_s28, 4  ;;  %s1705_s15 = int_to_ptr.hbm [resolvable:$true] %s1704_s15 }
 0x133   : > { %s1706_s13 = scalar_lea.hbm %s1705_s15, 256  ;;  %p1711_p2 = scmp.lt.s32.totalorder %s1705_s15, %s2951_s4 }
 0x134   : > { %p1707_p5 = scmp.ne.s32.totalorder %s1705_s15, %s1706_s13  ;;  %p1712_p9 = scmp.lt.s32.totalorder %s1710_s6, %s1706_s13 }
 0x136   : > { %p1708_p8 = pnand %p1707_p5, %p1952_p11  ;;  %p1713_p6 = por %p1712_p9, %p1711_p2 }
 0x138   : > { %p1709_p10 = pneg %p1708_p8 }
 0x13a   : > { %p1714_p13 = pnand %p1713_p6, %p1709_p10 }
 0x13c   : > { %1717 = shalt.err (!%p1714_p13)
}
 0x13d   : > { %s2990_s9 = smov 1024   ;;  %s2991_s7 = smov %s2989_s28  ;;  %v823_v33 = vsel %vm791_vm10, 1, %v1852_v6  ;;  %vm794_vm13 = vcmp.gt.f32.partialorder %v2235_v26, 1.0  ;;  %853 = vst [vmem:[%s2008_s21 + $0xc0] sm:$0xff] %v821_v14  ;;  %v824_v0 = vsel %vm792_vm11, 1, %v1852_v6  ;;  %vm795_vm14 = vcmp.gt.f32.partialorder %v2240_v28, 1.0 }
 0x13e   : > { %1566 = dma.vmem_to_hbm [thread:$0]  (%p1952_p11), %s2723_s0, 4096, %s2991_s7, %s2755_s8, %s2990_s9, %s2990_s9, %s1854_s30   ;;  %v825_v1 = vsel %vm793_vm12, 1, %v1852_v6  ;;  %vm796_vm15 = vcmp.gt.f32.partialorder %v2245_v30, 1.0  ;;  %v826_v2 = vsel %vm794_vm13, 1, %v1852_v6  ;;  %vm885_vm0 = vcmp.lt.f32.partialorder %v2210_v16, 5.0 }
 0x13f   : > { %854 = vst [vmem:[%s2008_s21 + $0xc8] sm:$0xff] %v822_v32  ;;  %v827_v3 = vsel %vm795_vm14, 1, %v1852_v6  ;;  %vm886_vm1 = vcmp.lt.f32.partialorder %v2215_v18, 5.0  ;;  %v828_v4 = vsel %vm796_vm15, 1, %v1852_v6  ;;  %vm887_vm2 = vcmp.lt.f32.partialorder %v2220_v20, 5.0  ;;  %s1140_s0 = scalar_lea.hbm %s2950_s3, %s2678_s29  ;;  %s1104_s15 = scalar_lea.hbm %s2948_s1, %s2678_s29 }
 0x140   : > { %855 = vst [vmem:[%s2008_s21 + $0xd0] sm:$0xff] %v823_v33  ;;  %v917_v5 = vsel %vm885_vm0, 1, %v1852_v6  ;;  %vm888_vm3 = vcmp.lt.f32.partialorder %v2225_v22, 5.0  ;;  %v918_v10 = vsel %vm886_vm1, 1, %v1852_v6  ;;  %vm889_vm4 = vcmp.lt.f32.partialorder %v2230_v24, 5.0  ;;  %s1176_s19 = scalar_lea.hbm %s2952_s5, %s2678_s29  ;;  %s1105_s29 = sshll.u32 %s2401_s10, 4  ;;  %s1106_s29 = int_to_ptr.vmem [resolvable:$true] %s1105_s29 }
 0x141   : > { %856 = vst [vmem:[%s2008_s21 + $0xd8] sm:$0xff] %v824_v0  ;;  %v919_v11 = vsel %vm887_vm2, 1, %v1852_v6  ;;  %vm890_vm5 = vcmp.lt.f32.partialorder %v2235_v26, 5.0  ;;  %v920_v39 = vsel %vm888_vm3, 1, %v1852_v6  ;;  %vm891_vm6 = vcmp.lt.f32.partialorder %v2240_v28, 5.0  ;;  %s2855_s6 = sshll.u32 %s1104_s15, 4  ;;  %s1108_s6 = int_to_ptr.hbm [resolvable:$true] %s2855_s6 }
 0x142   : > { %857 = vst [vmem:[%s2008_s21 + $0xe0] sm:$0xff] %v825_v1  ;;  %v921_v41 = vsel %vm889_vm4, 1, %v1852_v6  ;;  %vm892_vm7 = vcmp.lt.f32.partialorder %v2245_v30, 5.0  ;;  %v922_v43 = vsel %vm890_vm5, 1, %v1852_v6  ;;  %vm981_vm8 = vcmp.eq.f32.partialorder %v2210_v16, 3.0  ;;  %s2857_s16 = sshll.u32 %s1176_s19, 4  ;;  %s1180_s16 = int_to_ptr.hbm [resolvable:$true] %s2857_s16 }
 0x143   : > { %858 = vst [vmem:[%s2008_s21 + $0xe8] sm:$0xff] %v826_v2  ;;  %v923_v45 = vsel %vm891_vm6, 1, %v1852_v6  ;;  %vm982_vm9 = vcmp.eq.f32.partialorder %v2215_v18, 3.0  ;;  %v924_v47 = vsel %vm892_vm7, 1, %v1852_v6  ;;  %vm983_vm10 = vcmp.eq.f32.partialorder %v2220_v20, 3.0  ;;  %s1141_s7 = sshll.u32 %s2468_s25, 4  ;;  %s2869_s7 = int_to_ptr.vmem [resolvable:$true] %s1141_s7 }
 0x144   : > { %859 = vst [vmem:[%s2008_s21 + $0xf0] sm:$0xff] %v827_v3  ;;  %v1013_v49 = vsel %vm981_vm8, 1, %v1852_v6  ;;  %vm984_vm11 = vcmp.eq.f32.partialorder %v2225_v22, 3.0  ;;  %v1014_v16 = vsel %vm982_vm9, 1, %v1852_v6  ;;  %vm985_vm12 = vcmp.eq.f32.partialorder %v2230_v24, 3.0  ;;  %s1177_s11 = sshll.u32 %s2539_s12, 4  ;;  %s2873_s11 = int_to_ptr.vmem [resolvable:$true] %s1177_s11 }
 0x145   : > { %860 = vst [vmem:[%s2008_s21 + $0xf8] sm:$0xff] %v828_v4  ;;  %v1015_v18 = vsel %vm983_vm10, 1, %v1852_v6  ;;  %vm986_vm13 = vcmp.eq.f32.partialorder %v2235_v26, 3.0  ;;  %v1016_v20 = vsel %vm984_vm11, 1, %v1852_v6  ;;  %vm987_vm14 = vcmp.eq.f32.partialorder %v2240_v28, 3.0  ;;  %s1054_s10 = scalar_lea.sflag [#allocation4], %s1988_s26 }
 0x146   : > { %949 = vst [vmem:[%s2063_s22 + $0xc0] sm:$0xff] %v917_v5  ;;  %v1017_v22 = vsel %vm985_vm12, 1, %v1852_v6  ;;  %vm988_vm15 = vcmp.eq.f32.partialorder %v2245_v30, 3.0  ;;  %v1018_v24 = vsel %vm986_vm13, 1, %v1852_v6  ;;  %v1019_v26 = vsel %vm987_vm14, 1, %v1852_v6  ;;  %s1732_s21 = sshra.s32 %s1108_s6, 4  ;;  %s1733_s21 = int_to_ptr.hbm [resolvable:$true] %s1732_s21 }
 0x147   : > { %950 = vst [vmem:[%s2063_s22 + $0xc8] sm:$0xff] %v918_v10  ;;  %v1020_v28 = vsel %vm988_vm15, 1, %v1852_v6  ;;  %s1734_s25 = scalar_lea.hbm %s1733_s21, 256  ;;  %s1738_s14 = scalar_lea.hbm %s2948_s1, 512 }
 0x148   : > { %951 = vst [vmem:[%s2063_s22 + $0xd0] sm:$0xff] %v919_v11  ;;  %p1735_p0 = scmp.ne.s32.totalorder %s1733_s21, %s1734_s25  ;;  %p1739_p4 = scmp.lt.s32.totalorder %s1733_s21, %s2948_s1 }
 0x149   : > { %952 = vst [vmem:[%s2063_s22 + $0xd8] sm:$0xff] %v920_v39  ;;  %p1740_p7 = scmp.lt.s32.totalorder %s1738_s14, %s1734_s25 }
 0x14a   : > { %953 = vst [vmem:[%s2063_s22 + $0xe0] sm:$0xff] %v921_v41  ;;  %p1736_p1 = pnand %p1735_p0, %p1952_p11 }
 0x14b   : > { %954 = vst [vmem:[%s2063_s22 + $0xe8] sm:$0xff] %v922_v43  ;;  %p1741_p5 = por %p1740_p7, %p1739_p4 }
 0x14c   : > { %955 = vst [vmem:[%s2063_s22 + $0xf0] sm:$0xff] %v923_v45  ;;  %p1737_p3 = pneg %p1736_p1 }
 0x14d   : > { %956 = vst [vmem:[%s2063_s22 + $0xf8] sm:$0xff] %v924_v47  ;;  %s2847_s22 = sshll.u32 %s1140_s0, 4  ;;  %s1144_s22 = int_to_ptr.hbm [resolvable:$true] %s2847_s22 }
 0x14e   : > { %1045 = vst [vmem:[%s2093_s24 + $0xc0] sm:$0xff] %v1013_v49  ;;  %p1742_p8 = pnand %p1741_p5, %p1737_p3 }
 0x14f   : > { %1046 = vst [vmem:[%s2093_s24 + $0xc8] sm:$0xff] %v1014_v16 }
 0x150   : > { %1047 = vst [vmem:[%s2093_s24 + $0xd0] sm:$0xff] %v1015_v18 }
 0x151   : > { %1048 = vst [vmem:[%s2093_s24 + $0xd8] sm:$0xff] %v1016_v20 }
 0x152   : > { %1049 = vst [vmem:[%s2093_s24 + $0xe0] sm:$0xff] %v1017_v22 }
 0x153   : > { %1050 = vst [vmem:[%s2093_s24 + $0xe8] sm:$0xff] %v1018_v24 }
 0x154   : > { %1051 = vst [vmem:[%s2093_s24 + $0xf0] sm:$0xff] %v1019_v26 }
 0x155   : > { %1052 = vst [vmem:[%s2093_s24 + $0xf8] sm:$0xff] %v1020_v28 }
 0x156   : > { %1745 = shalt.err (!%p1742_p8)
}
 0x157   : > { %1563 = dma.vmem_to_hbm [thread:$0]  (%p1952_p11), %s1106_s29, 4096, %s1108_s6, %s1054_s10, %s2990_s9, %s2990_s9, %s1854_s30  }
 0x158   : > { %s1760_s26 = sshra.s32 %s1144_s22, 4  ;;  %s1766_s19 = scalar_lea.hbm %s2950_s3, 512  ;;  %s1761_s26 = int_to_ptr.hbm [resolvable:$true] %s1760_s26 }
 0x159   : > { %s1762_s24 = scalar_lea.hbm %s1761_s26, 256  ;;  %p1767_p6 = scmp.lt.s32.totalorder %s1761_s26, %s2950_s3 }
 0x15a   : > { %p1763_p10 = scmp.ne.s32.totalorder %s1761_s26, %s1762_s24  ;;  %p1768_p13 = scmp.lt.s32.totalorder %s1766_s19, %s1762_s24 }
 0x15c   : > { %p1764_p2 = pnand %p1763_p10, %p1952_p11  ;;  %p1769_p0 = por %p1768_p13, %p1767_p6 }
 0x15e   : > { %p1765_p9 = pneg %p1764_p2 }
 0x160   : > { %p1770_p1 = pnand %p1769_p0, %p1765_p9 }
 0x162   : > { %1773 = shalt.err (!%p1770_p1)
}
 0x163   : > { %1565 = dma.vmem_to_hbm [thread:$0]  (%p1952_p11), %s2869_s7, 4096, %s1144_s22, %s2732_s20, %s2990_s9, %s2990_s9, %s1854_s30  }
 0x164   : > { %s1788_s29 = sshra.s32 %s1180_s16, 4  ;;  %s1794_s0 = scalar_lea.hbm %s2952_s5, 512  ;;  %s1789_s29 = int_to_ptr.hbm [resolvable:$true] %s1788_s29 }
 0x165   : > { %s1790_s6 = scalar_lea.hbm %s1789_s29, 256  ;;  %p1795_p5 = scmp.lt.s32.totalorder %s1789_s29, %s2952_s5 }
 0x166   : > { %p1791_p3 = scmp.ne.s32.totalorder %s1789_s29, %s1790_s6  ;;  %p1796_p8 = scmp.lt.s32.totalorder %s1794_s0, %s1790_s6 }
 0x168   : > { %p1792_p4 = pnand %p1791_p3, %p1952_p11  ;;  %p1797_p10 = por %p1796_p8, %p1795_p5 }
 0x16a   : > { %p1793_p7 = pneg %p1792_p4 }
 0x16c   : > { %p1798_p2 = pnand %p1797_p10, %p1793_p7 }
 0x16e   : > { %1801 = shalt.err (!%p1798_p2)
}
 0x16f   : > { %1567 = dma.vmem_to_hbm [thread:$0]  (%p1952_p11), %s2873_s11, 4096, %s1180_s16, %s2755_s8, %s2990_s9, %s2990_s9, %s1854_s30  }
 0x170 PF: > { %s2992_s20 = sld [smem:[#allocation18_spill]]  ;;  %s1206_s22 = sand.u32 1, %s1836_s27  }
 0x171   : > { %s1207_s7 = scalar_lea.sflag [#allocation4], %s1206_s22 }
 0x176   : > { %p2993_p9 = scmp.ge.s32.totalorder %s2992_s20, 2 }
 0x178   : > { %p1578_p6 = pnand %p2993_p9, %p1956_p12 }
 0x17a   : > { %p1579_p13 = pneg %p1578_p6 }
 0x17c   : > { %1823 = dma.done.wait (%p1579_p13), %s1207_s7, 4096  }
 0x17d   : > { %1825 = vsyncadd (%p1579_p13), %s1207_s7, 4294963200  ;;  %s2994_s17 = sadd.s32 4294967294, %s2992_s20  }
 0x17e   : > { %s1216_s15 = sand.u32 1, %s2994_s17  }
 0x17f   : > { %s1217_s26 = scalar_lea.sflag [#allocation7], %s1216_s15 }
 0x180   : > { %1827 = dma.done.wait (%p1579_p13), %s1217_s26, 8192  }
 0x181   : > { %1829 = vsyncadd (%p1579_p13), %s1217_s26, 4294959104  ;;  %s1237_s24 = scalar_lea.sflag [#allocation10], %s1216_s15 }
 0x182   : > { %1831 = dma.done.wait (%p1579_p13), %s1237_s24, 8192  }
 0x183   : > { %1833 = vsyncadd (%p1579_p13), %s1237_s24, 4294959104  ;;  %s2995_s30 = sld [smem:[#allocation19_spill]] }
 0x184   : > { %s2996_s27 = sld [smem:[#allocation16_spill]] }
 0x185   : > { %s2997_s28 = sld [smem:[#allocation17_spill]] }
 0x186   : > { %s2998_s29 = sld [smem:[#allocation20_spill]] }
 0x189   : > { %p28_p11 = scmp.ge.s32.totalorder %s2995_s30, 4  }
 0x18b   :  { %30 = sbr.rel (!%p28_p11) target bundleno = 14 (0xe), region = 169 }
 0x190   :  { %1280 = vsyncpa [#allocation3], 1 }
 0x191   :  { %1282 = vsyncpa [#allocation3 + $0x1], 1 }
 0x192   :  { %1283 = vsyncpa [#allocation4], 1 }
 0x193   :  { %1285 = vsyncpa [#allocation4 + $0x1], 1 }
 0x194   :  { %1286 = vsyncpa [#allocation7], 1 }
 0x195   :  { %1288 = vsyncpa [#allocation7 + $0x1], 1 }
 0x196   :  { %1289 = vsyncpa [#allocation10], 1 }
 0x197   :  { %1291 = vsyncpa [#allocation10 + $0x1], 1 }

// kernel: _forward_impl.1
= control target key start
LH: loop header
LB: loop body
LE: loop exit
PB: predicated region body
PF: predicated region fallthrough
CT: control target
= control target key end

     0   :  { %v365_v2 = vmov 0   ;;  %vm618_vm2 = vcmask 1040384   ;;  %vm129_vm3 = vsmask.f32 256  ;;  %vm131_vm4 = vcmask 1041409   ;;  %s607_s0 = inlined_call_operand.vmem [shape: f32[2,1024], index: 0, kind: input, shape index: {}]   ;;  %s608_s6 = inlined_call_operand.vmem [shape: u8[2,1024], index: 6, kind: output, shape index: {5}]   ;;  %s609_s1 = inlined_call_operand.vmem [shape: f32[2,1024], index: 1, kind: output, shape index: {0}]   ;;  %s610_s2 = inlined_call_operand.vmem [shape: f32[2,1024], index: 2, kind: output, shape index: {1}]   ;;  %s611_s3 = inlined_call_operand.vmem [shape: f32[2,1024], index: 3, kind: output, shape index: {2}]   ;;  %s612_s4 = inlined_call_operand.vmem [shape: f32[2,1024], index: 4, kind: output, shape index: {3}]   ;;  %s613_s5 = inlined_call_operand.vmem [shape: f32[2,1024], index: 5, kind: output, shape index: {4}]   ;;  %s614_s7 = inlined_call_operand.vmem [shape: u8[2,1024], index: 7, kind: output, shape index: {6}]   ;;  %s615_s8 = inlined_call_operand.vmem [shape: u8[2,1024], index: 8, kind: output, shape index: {7}]  }
   0x1   :  { %v414_v0 = vld [vmem:[%s607_s0] sm:$0xff]  ;;  %v419_v1 = vld [vmem:[%s607_s0 + $0x8] sm:$0xff]  ;;  %vm132_vm5 = vsmask.f32 1280  ;;  %vm426_vm6 = vmand %vm618_vm2, %vm129_vm3  ;;  %vm616_vm8 = vcmask 1042434   ;;  %vm139_vm10 = vcmask 1043459  }
   0x2   :  { %vm40_vm0 = vcmp.gt.f32.partialorder %v414_v0, 1.0  ;;  %vm41_vm1 = vcmp.gt.f32.partialorder %v419_v1, 1.0  ;;  %vm430_vm7 = vmand %vm131_vm4, %vm132_vm5  ;;  %vm136_vm9 = vsmask.f32 2304  ;;  %vm140_vm11 = vsmask.f32 3328 }
   0x3   :  { %v42_v3 = vsel %vm40_vm0, 1, %v365_v2  ;;  %v43_v4 = vsel %vm41_vm1, 1, %v365_v2  ;;  %vm134_vm12 = vmor %vm430_vm7, %vm426_vm6  ;;  %vm617_vm5 = vcmask 1044484   ;;  %vm144_vm6 = vsmask.f32 4352  ;;  %v159_v56 = vld [vmem:[%s608_s6] sm:$0xff] }
   0x4   :  { %44 = vst [vmem:[#allocation1] ss:$2 sm:$0xff] %v42_v3  ;;  %vm137_vm13 = vmand %vm616_vm8, %vm136_vm9  ;;  %v20_v6 = vadd.f32 2.0, %v414_v0 }
   0x5   :  { %46 = vst [vmem:[#allocation1 + $0x10] ss:$2 sm:$0xff] %v43_v4  ;;  %vm138_vm3 = vmor %vm137_vm13, %vm134_vm12  ;;  %vm119_vm12 = vcmask 1046534  }
   0x6   :  { %vm141_vm4 = vmand %vm139_vm10, %vm140_vm11  ;;  %vm163_vm10 = vcmp.lt.f32.partialorder %v419_v1, 5.0  ;;  %22 = vst [vmem:[%s609_s1] sm:$0xff] %v20_v6 }
   0x7   :  { %vm142_vm9 = vmor %vm141_vm4, %vm138_vm3  ;;  %v165_v22 = vsel %vm163_vm10, 1, %v365_v2  ;;  %vm152_vm3 = vsmask.f32 6400 }
   0x8   :  { %vm153_vm4 = vmand %vm119_vm12, %vm152_vm3 }
   0xb   :  { %v47_v7 = vld.sshfl [vmem:[#allocation1] sm:$0xff pattern:$0x75643120]  ;;  %v48_v8 = vld.sshfl [vmem:[#allocation1 + $0x8] sm:$0xff pattern:$0x75643120] }
   0xc   :  { %v49_v9 = vld.sshfl [vmem:[#allocation1 + $0x10] sm:$0xff pattern:$0x75643120]  ;;  %v50_v10 = vld.sshfl [vmem:[#allocation1 + $0x18] sm:$0xff pattern:$0x75643120] }
   0xd   :  { %vm51_vm14 = vcmp.ne.s32.totalorder %v47_v7, 0  ;;  %vm52_vm15 = vcmp.ne.s32.totalorder %v48_v8, 0  ;;  %vm53_vm0 = vcmp.ne.s32.totalorder %v49_v9, 0  ;;  %vm54_vm1 = vcmp.ne.s32.totalorder %v50_v10, 0 }
   0xe   :  { %v55_v11 = vsel %vm51_vm14, 1, %v365_v2  ;;  %v56_v12 = vsel %vm52_vm15, 1, %v365_v2  ;;  %v57_v13 = vsel %vm53_vm0, 1, %v365_v2  ;;  %v58_v14 = vsel %vm54_vm1, 1, %v365_v2  ;;  %vm145_vm14 = vmand %vm617_vm5, %vm144_vm6 }
   0xf   :  { %v59_v15 = vpack.c.b16 %v56_v12, %v55_v11  ;;  %v60_v16 = vpack.c.b16 %v58_v14, %v57_v13  ;;  %vm147_vm15 = vcmask 1045509   ;;  %vm148_vm0 = vsmask.f32 5376  ;;  %vm448_vm8 = vmor %vm145_vm14, %vm142_vm9 }
  0x10   :  { %vm162_vm1 = vcmp.lt.f32.partialorder %v414_v0, 5.0  ;;  %vm453_vm11 = vmand %vm147_vm15, %vm148_vm0  ;;  %vm156_vm6 = vsmask.f32 7424  ;;  %vm155_vm15 = vcmask 1047559   ;;  %v21_v7 = vadd.f32 2.0, %v419_v1 }
  0x11   :  { %v61_v17 = vpack.c.b8 %v60_v16, %v59_v15  ;;  %v164_v21 = vsel %vm162_vm1, 1, %v365_v2  ;;  %vm150_vm13 = vmor %vm453_vm11, %vm448_vm8  ;;  %vm631_vm8 = vcmask 1044484   ;;  %v362_v8 = vadd.f32 -3.0, %v414_v0 }
  0x12   :  { %vm478_vm3 = vmor %vm153_vm4, %vm150_vm13  ;;  %vm632_vm4 = vcmask 1041408   ;;  %v363_v10 = vadd.f32 -3.0, %v419_v1  ;;  %23 = vst [vmem:[%s609_s1 + $0x8] sm:$0xff] %v21_v7  ;;  %v28_v11 = vmul.f32 4.0, %v414_v0  ;;  %v29_v13 = vmul.f32 4.0, %v419_v1 }
  0x13   :  { %vm62_vm7 = vnez %v61_v17  ;;  %26 = vst [vmem:[%s610_s2] sm:$0xff] %v362_v8  ;;  %v32_v14 = vmul.f32 0.5, %v414_v0  ;;  %v33_v15 = vmul.f32 0.5, %v419_v1  ;;  %v36_v16 = vmul.f32 %v414_v0, %v414_v0 }
  0x14   :  { %v63_v18 = vsel %vm62_vm7, 16843009, %v365_v2  ;;  %27 = vst [vmem:[%s610_s2 + $0x8] sm:$0xff] %v363_v10  ;;  %v37_v17 = vmul.f32 %v419_v1, %v419_v1 }
  0x15   :  { %65 = vst [vmem:[#allocation1] ss:$9 sm:$0xff] %v63_v18 }
  0x16   :  { %30 = vst [vmem:[%s611_s3] sm:$0xff] %v28_v11 }
  0x17   :  { %31 = vst [vmem:[%s611_s3 + $0x8] sm:$0xff] %v29_v13 }
  0x18   :  { %34 = vst [vmem:[%s612_s4] sm:$0xff] %v32_v14 }
  0x19   :  { %35 = vst [vmem:[%s612_s4 + $0x8] sm:$0xff] %v33_v15 }
  0x1a   :  { %38 = vst [vmem:[%s613_s5] sm:$0xff] %v36_v16 }
  0x1b   :  { %39 = vst [vmem:[%s613_s5 + $0x8] sm:$0xff] %v37_v17 }
  0x1c   :  { %v66_v23 = vld [vmem:[#allocation1] sm:$0xff]  ;;  %v68_v24 = vld [vmem:[#allocation1 + $0x9] sm:$0xff]  ;;  %v70_v25 = vld [vmem:[#allocation1 + $0x12] sm:$0xff] }
  0x1d   :  { %166 = vst [vmem:[#allocation1] ss:$2 sm:$0xff] %v164_v21  ;;  %v72_v26 = vld [vmem:[#allocation1 + $0x1b] sm:$0xff]  ;;  %v74_v27 = vld [vmem:[#allocation1 + $0x24] sm:$0xff]  ;;  %v76_v28 = vld [vmem:[#allocation1 + $0x2d] sm:$0xff]  ;;  %vm82_vm7 = vnez %v66_v23  ;;  %vm83_vm9 = vnez %v68_v24  ;;  %vm84_vm14 = vnez %v70_v25 }
  0x1e   :  { %168 = vst [vmem:[#allocation1 + $0x10] ss:$2 sm:$0xff] %v165_v22  ;;  %v78_v29 = vld [vmem:[#allocation1 + $0x36] sm:$0xff]  ;;  %v80_v30 = vld [vmem:[#allocation1 + $0x3f] sm:$0xff]  ;;  %vm85_vm0 = vnez %v72_v26  ;;  %vm86_vm1 = vnez %v74_v27  ;;  %vm87_vm10 = vnez %v76_v28  ;;  %v90_v31 = vsel %vm82_vm7, 16843009, %v365_v2 }
  0x1f   :  { %vm88_vm5 = vnez %v78_v29  ;;  %vm89_vm2 = vnez %v80_v30  ;;  %v91_v32 = vsel %vm83_vm9, 16843009, %v365_v2  ;;  %v92_v33 = vsel %vm84_vm14, 16843009, %v365_v2 }
  0x20   :  { %v93_v34 = vsel %vm85_vm0, 16843009, %v365_v2  ;;  %v94_v35 = vsel %vm86_vm1, 16843009, %v365_v2  ;;  %v95_v36 = vsel %vm87_vm10, 16843009, %v365_v2 }
  0x21   :  { %v96_v37 = vsel %vm88_vm5, 16843009, %v365_v2  ;;  %v97_v38 = vsel %vm89_vm2, 16843009, %v365_v2  ;;  %v98_v39 = vrot.slane %v91_v32, 7  ;;  %v99_v40 = vrot.slane %v92_v33, 6  ;;  %vm157_vm5 = vmand %vm155_vm15, %vm156_vm6 }
  0x22   :  { %v100_v42 = vrot.slane %v93_v34, 5  ;;  %v101_v43 = vrot.slane %v94_v35, 4  ;;  %v102_v44 = vrot.slane %v95_v36, 3  ;;  %v103_v45 = vrot.slane %v96_v37, 2  ;;  %vm491_vm6 = vmor %vm157_vm5, %vm478_vm3 }
  0x23   :  { %v104_v46 = vrot.slane %v97_v38, 1  ;;  %vm629_vm2 = vcmask 1040384   ;;  %vm123_vm7 = vcmask 1045508   ;;  %vm125_vm9 = vcmask 1043456  }
  0x24   :  { %v108_v47 = vsel %vm629_vm2, %v90_v31, %v98_v39  ;;  %v169_v48 = vld.sshfl [vmem:[#allocation1] sm:$0xff pattern:$0x75643120]  ;;  %v170_v49 = vld.sshfl [vmem:[#allocation1 + $0x8] sm:$0xff pattern:$0x75643120]  ;;  %v118_v51 = vsel %vm631_vm8, %v101_v43, %v102_v44 }
  0x25   :  { %vm630_vm14 = vcmask 1042434   ;;  %vm173_vm11 = vcmp.ne.s32.totalorder %v169_v48, 0  ;;  %vm174_vm13 = vcmp.ne.s32.totalorder %v170_v49, 0  ;;  %v171_v52 = vld.sshfl [vmem:[#allocation1 + $0x10] sm:$0xff pattern:$0x75643120]  ;;  %v122_v54 = vsel %vm119_vm12, %v103_v45, %v104_v46 }
  0x26   :  { %v112_v50 = vsel %vm630_vm14, %v99_v40, %v100_v42  ;;  %v177_v57 = vsel %vm173_vm11, 1, %v365_v2  ;;  %v178_v58 = vsel %vm174_vm13, 1, %v365_v2  ;;  %v172_v59 = vld.sshfl [vmem:[#allocation1 + $0x18] sm:$0xff pattern:$0x75643120]  ;;  %vm175_vm15 = vcmp.ne.s32.totalorder %v171_v52, 0 }
  0x27   :  { %v114_v53 = vsel %vm632_vm4, %v108_v47, %v112_v50  ;;  %v124_v60 = vsel %vm123_vm7, %v118_v51, %v122_v54  ;;  %v181_v61 = vpack.c.b16 %v178_v58, %v177_v57  ;;  %vm176_vm0 = vcmp.ne.s32.totalorder %v172_v59, 0  ;;  %v243_v44 = vld [vmem:[%s614_s7] sm:$0xff] }
  0x28   :  { %v179_v62 = vsel %vm175_vm15, 1, %v365_v2  ;;  %v126_v63 = vsel %vm125_vm9, %v114_v53, %v124_v60  ;;  %v180_v3 = vsel %vm176_vm0, 1, %v365_v2  ;;  %vm246_vm10 = vcmp.eq.f32.partialorder %v414_v0, 3.0 }
  0x29   :  { %v160_v4 = vsel %vm491_vm6, %v126_v63, %v159_v56  ;;  %v182_v5 = vpack.c.b16 %v180_v3, %v179_v62  ;;  %vm247_vm3 = vcmp.eq.f32.partialorder %v419_v1, 3.0  ;;  %v248_v18 = vsel %vm246_vm10, 1, %v365_v2 }
  0x2a   :  { %161 = vst [vmem:[%s608_s6] sm:$0xff] %v160_v4  ;;  %v249_v0 = vsel %vm247_vm3, 1, %v365_v2  ;;  %vm635_vm0 = vcmask 1040384   ;;  %vm637_vm10 = vcmask 1044484   ;;  %vm638_vm3 = vcmask 1041408  }
  0x2b   :  { %v183_v9 = vpack.c.b8 %v182_v5, %v181_v61 }
  0x2d   :  { %vm184_vm1 = vnez %v183_v9 }
  0x2e   :  { %v185_v12 = vsel %vm184_vm1, 16843009, %v365_v2  ;;  %vm636_vm1 = vcmask 1042434  }
  0x2f   :  { %187 = vst [vmem:[#allocation1] ss:$9 sm:$0xff] %v185_v12 }
  0x36   :  { %v192_v19 = vld [vmem:[#allocation1 + $0x12] sm:$0xff]  ;;  %v194_v20 = vld [vmem:[#allocation1 + $0x1b] sm:$0xff]  ;;  %v190_v1 = vld [vmem:[#allocation1 + $0x9] sm:$0xff] }
  0x37   :  { %v188_v21 = vld [vmem:[#allocation1] sm:$0xff]  ;;  %v198_v23 = vld [vmem:[#allocation1 + $0x2d] sm:$0xff]  ;;  %vm206_vm2 = vnez %v192_v19  ;;  %vm207_vm14 = vnez %v194_v20  ;;  %v200_v24 = vld [vmem:[#allocation1 + $0x36] sm:$0xff]  ;;  %vm205_vm8 = vnez %v190_v1  ;;  %252 = vst [vmem:[#allocation1 + $0x10] ss:$2 sm:$0xff] %v249_v0 }
  0x38   :  { %v196_v22 = vld [vmem:[#allocation1 + $0x24] sm:$0xff]  ;;  %vm204_vm5 = vnez %v188_v21  ;;  %250 = vst [vmem:[#allocation1] ss:$2 sm:$0xff] %v248_v18  ;;  %vm209_vm13 = vnez %v198_v23  ;;  %vm210_vm4 = vnez %v200_v24  ;;  %v213_v27 = vsel %vm205_vm8, 16843009, %v365_v2 }
  0x39   :  { %v202_v25 = vld [vmem:[#allocation1 + $0x3f] sm:$0xff]  ;;  %vm208_vm11 = vnez %v196_v22  ;;  %v212_v26 = vsel %vm204_vm5, 16843009, %v365_v2  ;;  %v214_v28 = vsel %vm206_vm2, 16843009, %v365_v2  ;;  %v220_v34 = vrot.slane %v213_v27, 7 }
  0x3a   :  { %vm211_vm15 = vnez %v202_v25  ;;  %v215_v29 = vsel %vm207_vm14, 16843009, %v365_v2  ;;  %v216_v30 = vsel %vm208_vm11, 16843009, %v365_v2  ;;  %v217_v31 = vsel %vm209_vm13, 16843009, %v365_v2 }
  0x3b   :  { %v218_v32 = vsel %vm210_vm4, 16843009, %v365_v2  ;;  %v219_v33 = vsel %vm211_vm15, 16843009, %v365_v2  ;;  %v221_v35 = vrot.slane %v214_v28, 6  ;;  %v222_v36 = vrot.slane %v215_v29, 5 }
  0x3c   :  { %v223_v37 = vrot.slane %v216_v30, 4  ;;  %v224_v38 = vrot.slane %v217_v31, 3  ;;  %v225_v39 = vrot.slane %v218_v32, 2  ;;  %v226_v40 = vrot.slane %v219_v33, 1 }
  0x3d   :  { %v229_v41 = vsel %vm635_vm0, %v212_v26, %v220_v34  ;;  %v232_v42 = vsel %vm636_vm1, %v221_v35, %v222_v36 }
  0x3e   :  { %v236_v43 = vsel %vm637_vm10, %v223_v37, %v224_v38  ;;  %v233_v47 = vsel %vm638_vm3, %v229_v41, %v232_v42  ;;  %v239_v48 = vsel %vm119_vm12, %v225_v39, %v226_v40  ;;  %v255_v49 = vld.sshfl [vmem:[#allocation1 + $0x10] sm:$0xff pattern:$0x75643120]  ;;  %v256_v53 = vld.sshfl [vmem:[#allocation1 + $0x18] sm:$0xff pattern:$0x75643120] }
  0x3f   :  { %v253_v45 = vld.sshfl [vmem:[#allocation1] sm:$0xff pattern:$0x75643120]  ;;  %v254_v46 = vld.sshfl [vmem:[#allocation1 + $0x8] sm:$0xff pattern:$0x75643120]  ;;  %v240_v50 = vsel %vm123_vm7, %v236_v43, %v239_v48 }
  0x40   :  { %vm257_vm5 = vcmp.ne.s32.totalorder %v253_v45, 0  ;;  %vm258_vm2 = vcmp.ne.s32.totalorder %v254_v46, 0  ;;  %vm259_vm14 = vcmp.ne.s32.totalorder %v255_v49, 0  ;;  %v241_v54 = vsel %vm125_vm9, %v233_v47, %v240_v50 }
  0x41   :  { %v261_v51 = vsel %vm257_vm5, 1, %v365_v2  ;;  %v262_v52 = vsel %vm258_vm2, 1, %v365_v2  ;;  %vm260_vm8 = vcmp.ne.s32.totalorder %v256_v53, 0  ;;  %v263_v57 = vsel %vm259_vm14, 1, %v365_v2 }
  0x42   :  { %v265_v56 = vpack.c.b16 %v262_v52, %v261_v51  ;;  %v244_v58 = vsel %vm491_vm6, %v241_v54, %v243_v44  ;;  %v264_v59 = vsel %vm260_vm8, 1, %v365_v2  ;;  %vm639_vm2 = vcmask 1040384  }
  0x43   :  { %245 = vst [vmem:[%s614_s7] sm:$0xff] %v244_v58  ;;  %v266_v60 = vpack.c.b16 %v264_v59, %v263_v57  ;;  %vm640_vm14 = vcmask 1042434   ;;  %vm641_vm8 = vcmask 1044484  }
  0x45   :  { %v267_v61 = vpack.c.b8 %v266_v60, %v265_v56 }
  0x47   :  { %vm268_vm11 = vnez %v267_v61 }
  0x48   :  { %v269_v62 = vsel %vm268_vm11, 16843009, %v365_v2  ;;  %vm642_vm11 = vcmask 1041408  }
  0x49   :  { %271 = vst [vmem:[#allocation1] ss:$9 sm:$0xff] %v269_v62 }
  0x50   :  { %v272_v63 = vld [vmem:[#allocation1] sm:$0xff]  ;;  %v274_v3 = vld [vmem:[#allocation1 + $0x9] sm:$0xff]  ;;  %v276_v4 = vld [vmem:[#allocation1 + $0x12] sm:$0xff] }
  0x51   :  { %v278_v5 = vld [vmem:[#allocation1 + $0x1b] sm:$0xff]  ;;  %v280_v6 = vld [vmem:[#allocation1 + $0x24] sm:$0xff]  ;;  %v282_v7 = vld [vmem:[#allocation1 + $0x2d] sm:$0xff]  ;;  %vm288_vm13 = vnez %v272_v63  ;;  %vm289_vm4 = vnez %v274_v3  ;;  %vm290_vm15 = vnez %v276_v4 }
  0x52   :  { %v284_v8 = vld [vmem:[#allocation1 + $0x36] sm:$0xff]  ;;  %v286_v9 = vld [vmem:[#allocation1 + $0x3f] sm:$0xff]  ;;  %vm291_vm0 = vnez %v278_v5  ;;  %vm292_vm1 = vnez %v280_v6  ;;  %vm293_vm10 = vnez %v282_v7  ;;  %v296_v10 = vsel %vm288_vm13, 16843009, %v365_v2 }
  0x53   :  { %vm294_vm3 = vnez %v284_v8  ;;  %vm295_vm5 = vnez %v286_v9  ;;  %v297_v11 = vsel %vm289_vm4, 16843009, %v365_v2  ;;  %v298_v12 = vsel %vm290_vm15, 16843009, %v365_v2 }
  0x54   :  { %v299_v13 = vsel %vm291_vm0, 16843009, %v365_v2  ;;  %v300_v14 = vsel %vm292_vm1, 16843009, %v365_v2  ;;  %v301_v15 = vsel %vm293_vm10, 16843009, %v365_v2 }
  0x55   :  { %v302_v16 = vsel %vm294_vm3, 16843009, %v365_v2  ;;  %v303_v17 = vsel %vm295_vm5, 16843009, %v365_v2  ;;  %v304_v18 = vrot.slane %v297_v11, 7  ;;  %v305_v0 = vrot.slane %v298_v12, 6 }
  0x56   :  { %v306_v19 = vrot.slane %v299_v13, 5  ;;  %v307_v20 = vrot.slane %v300_v14, 4  ;;  %v308_v21 = vrot.slane %v301_v15, 3  ;;  %v309_v1 = vrot.slane %v302_v16, 2  ;;  %v327_v2 = vld [vmem:[%s615_s8] sm:$0xff] }
  0x57   :  { %v310_v22 = vrot.slane %v303_v17, 1  ;;  %v313_v23 = vsel %vm639_vm2, %v296_v10, %v304_v18 }
  0x58   :  { %v316_v24 = vsel %vm640_vm14, %v305_v0, %v306_v19  ;;  %v320_v25 = vsel %vm641_vm8, %v307_v20, %v308_v21 }
  0x59   :  { %v317_v26 = vsel %vm642_vm11, %v313_v23, %v316_v24  ;;  %v323_v27 = vsel %vm119_vm12, %v309_v1, %v310_v22 }
  0x5a   :  { %v324_v28 = vsel %vm123_vm7, %v320_v25, %v323_v27 }
  0x5b   :  { %v325_v29 = vsel %vm125_vm9, %v317_v26, %v324_v28 }
  0x5c   :  { %v328_v30 = vsel %vm491_vm6, %v325_v29, %v327_v2 }
  0x5d   :  { %329 = vst [vmem:[%s615_s8] sm:$0xff] %v328_v30 }

</bundles_post_ra>
